<compile_context>
chip_gen: v7x
topology: tpu7x:2x2x1
jax: 0.10.0
libtpu: 0.0.40
codegen_flags: <defaults>
</compile_context>

<pallas_src>
import functools
import numpy as np
import jax
import jax.numpy as jnp
from jax import lax
from jax.experimental import pallas as pl
from jax.experimental.pallas import tpu as pltpu


# ----------------------------------------------------------------------------
# Host-side helper: fold an inference-mode BatchNorm into (scale, shift).
# ----------------------------------------------------------------------------
def _fold_bn(g, b, m, v, eps=1e-5):
    s = np.asarray(g, np.float32) / np.sqrt(np.asarray(v, np.float32) + eps)
    t = np.asarray(b, np.float32) - np.asarray(m, np.float32) * s
    return s.astype(np.float32), t.astype(np.float32)


def _pick_b_blk(N, HW):
    """Largest sensible batch block: divides N, keeps >= 2 grid steps when
    N >= 2 (both v7x TCs get work), and prefers B_blk*HW >= 256 so one
    projection matmul fills the 256-row MXU (v6e/v7x)."""
    divisors = [d for d in range(1, N + 1) if N % d == 0]
    cands = [d for d in divisors if N // d >= 2] or divisors
    for d in cands:                       # ascending -> smallest that reaches 256
        if d * HW >= 256:
            return d
    return cands[-1]


def _vmem_estimate_bytes(b_blk, HW, C, WQKV):
    m = b_blk * HW
    blocks = 2 * (m * C * 2 + m * C * 4)                        # x bf16 + out f32, 2x buffered
    consts = 2 * (2 * C * C * 2 + C * WQKV * 2 + 8 * WQKV * 4)  # w1,w3,wqkv bf16; rows f32
    interm = m * C * 4 * 4 + m * WQKV * 4 * 2 + b_blk * HW * HW * 4 * 2
    return blocks + consts + interm


# ----------------------------------------------------------------------------
# Pallas kernel: one batch-block per grid step.
#   x_ref    : (B_blk, HW, C)      bf16
#   w1_ref   : (C, C)              bf16   net1 conv, BN1 scale folded
#   wqkv_ref : (C, WQKV)           bf16   lane-aligned fused Q|K|V conv
#   w3_ref   : (C, C)              bf16   net3 conv, BN3 scale folded
#   rows_ref : (8, WQKV)           f32    stacked per-channel rows:
#              row0=t1, row1=bqkv, row2=gamma*s2, row3=s2, row4=t2, row5=t3
#   o_ref    : (B_blk, HW, C)      f32
# ----------------------------------------------------------------------------
def _self_attn_kernel(qk_pad, x_ref, w1_ref, wqkv_ref, w3_ref, rows_ref, o_ref):
    bb, hw, c = x_ref.shape
    m = bb * hw

    x = x_ref[...]                                   # (bb, hw, c) bf16
    xf = x.reshape(m, c)                             # (m, c)      bf16

    rows = rows_ref[...]                             # (8, WQKV)   f32
    t1 = rows[0:1, :c]
    bqkv = rows[1:2, :]
    g2 = rows[2:3, :c]
    s2 = rows[3:4, :c]
    t2 = rows[4:5, :c]
    t3 = rows[5:6, :c]

    # net1 (1x1 conv, BN1 folded) + ReLU.  bf16 MXU operands, f32 accumulate.
    a = jnp.maximum(
        jnp.dot(xf, w1_ref[...], preferred_element_type=jnp.float32) + t1, 0.0)

    # fused, 128-lane-aligned Q|K|V projection (padded columns are exactly 0).
    qkv = jnp.dot(a.astype(jnp.bfloat16), wqkv_ref[...],
                  preferred_element_type=jnp.float32) + bqkv
    q = qkv[:, :qk_pad].reshape(bb, hw, qk_pad).astype(jnp.bfloat16)
    k = qkv[:, qk_pad:2 * qk_pad].reshape(bb, hw, qk_pad).astype(jnp.bfloat16)
    v = qkv[:, 2 * qk_pad:].reshape(bb, hw, c).astype(jnp.bfloat16)

    # attention: energy = q @ k^T (zero-padded lanes contribute nothing),
    # row softmax, weighted sum of values; normalize AFTER p@v (small tensor).
    e = jnp.einsum('bqc,bkc->bqk', q, k, preferred_element_type=jnp.float32)
    e = e - jnp.max(e, axis=-1, keepdims=True)
    p = jnp.exp(e)
    denom = jnp.sum(p, axis=-1, keepdims=True)       # (bb, hw, 1), >= 1
    o_att = jnp.einsum('bqk,bkc->bqc', p.astype(jnp.bfloat16), v,
                       preferred_element_type=jnp.float32)
    o_att = (o_att * pl.reciprocal(denom, approx=True)).reshape(m, c)

    # gamma * attn_out + a, then BN2 (folded: g2 = gamma * s2)
    y2 = o_att * g2 + a * s2 + t2

    # net3: ReLU -> 1x1 conv (BN3 folded into the weight columns)
    y3 = jnp.dot(jnp.maximum(y2, 0.0).astype(jnp.bfloat16), w3_ref[...],
                 preferred_element_type=jnp.float32) + t3

    # residual (identity shortcut, sk=True) + final ReLU
    out = jnp.maximum(y3 + xf.astype(jnp.float32), 0.0)
    o_ref[...] = out.reshape(bb, hw, c).astype(o_ref.dtype)


# ----------------------------------------------------------------------------
# Host-side parameter folding (inference-mode BN, gamma folded into BN2).
# ----------------------------------------------------------------------------
def _fold_params(params, C):
    C8 = max(C // 8, 1)
    qk_pad = ((C8 + 127) // 128) * 128        # 128-lane aligned q/k segments
    wqkv_w = 2 * qk_pad + C

    s1, t1 = _fold_bn(params["g1"], params["b1"], params["m1"], params["v1"])
    s2, t2 = _fold_bn(params["g2"], params["b2"], params["m2"], params["v2"])
    s3, t3 = _fold_bn(params["g3"], params["b3"], params["m3"], params["v3"])

    # net1 1x1 conv (OIHW) -> (Cin, Cout), BN1 scale folded into output columns
    w1 = np.asarray(params["w_net1"], np.float32)[:, :, 0, 0]
    w1f = (w1.T * s1[None, :]).astype(np.float32)

    # fused Q|K|V projection, zero-padded so each segment starts on lane 0/128k
    wq = np.asarray(params["wq"], np.float32)[:, :, 0, 0].T          # (C, C8)
    wk = np.asarray(params["wk"], np.float32)[:, :, 0, 0].T          # (C, C8)
    wv = np.asarray(params["wv"], np.float32)[:, :, 0, 0].T          # (C, C)
    wqkv = np.zeros((C, wqkv_w), np.float32)
    wqkv[:, :C8] = wq
    wqkv[:, qk_pad:qk_pad + C8] = wk
    wqkv[:, 2 * qk_pad:] = wv
    bqkv = np.zeros((wqkv_w,), np.float32)
    bqkv[:C8] = np.asarray(params["bq"], np.float32)
    bqkv[qk_pad:qk_pad + C8] = np.asarray(params["bk"], np.float32)
    bqkv[2 * qk_pad:] = np.asarray(params["bv"], np.float32)

    gamma = float(params["gamma"])

    # net3 1x1 conv, BN3 scale folded into output columns
    w3 = np.asarray(params["w_net3"], np.float32)[:, :, 0, 0]
    w3f = (w3.T * s3[None, :]).astype(np.float32)

    # stack the six 1xC / 1xWQKV rows into ONE (8, WQKV) constant
    rows = np.zeros((8, wqkv_w), np.float32)
    rows[0, :C] = t1
    rows[1, :] = bqkv
    rows[2, :C] = gamma * s2
    rows[3, :C] = s2
    rows[4, :C] = t2
    rows[5, :C] = t3

    folded = {
        "w1": jnp.asarray(w1f, jnp.bfloat16),
        "wqkv": jnp.asarray(wqkv, jnp.bfloat16),
        "w3": jnp.asarray(w3f, jnp.bfloat16),
        "rows": jnp.asarray(rows, jnp.float32),
    }
    return folded, qk_pad, wqkv_w


# ----------------------------------------------------------------------------
# Channel-last slab entry point: x_slab (N, HW, C)  ->  (N, HW, C) f32.
# (Preferred: keeps the kernel free of host-side layout transposes.)
# ----------------------------------------------------------------------------
def self_attn_forward_slab(x_slab, folded, qk_pad, wqkv_w, b_blk=None):
    N, HW, C = x_slab.shape
    if b_blk is None:
        b_blk = _pick_b_blk(N, HW)
    assert N % b_blk == 0
    grid = N // b_blk

    x_slab = x_slab.astype(jnp.bfloat16)   # half DMA bytes + native MXU dtype

    consts = [folded["w1"], folded["wqkv"], folded["w3"], folded["rows"]]

    def const_spec(a):
        nd = a.ndim
        return pl.BlockSpec(a.shape, lambda b, _nd=nd: (0,) * _nd)

    vmem_limit = int(min(64 << 20,
                         max(32 << 20,
                             2 * _vmem_estimate_bytes(b_blk, HW, C, wqkv_w))))

    kernel = functools.partial(_self_attn_kernel, qk_pad)

    return pl.pallas_call(
        kernel,
        out_shape=jax.ShapeDtypeStruct((N, HW, C), jnp.float32),
        grid_spec=pltpu.PrefetchScalarGridSpec(
            num_scalar_prefetch=0,
            grid=(grid,),
            in_specs=[pl.BlockSpec((b_blk, HW, C), lambda b: (b, 0, 0))]
                     + [const_spec(c) for c in consts],
            out_specs=pl.BlockSpec((b_blk, HW, C), lambda b: (b, 0, 0)),
        ),
        compiler_params=pltpu.CompilerParams(
            dimension_semantics=("parallel",),
            vmem_limit_bytes=vmem_limit),
    )(x_slab, *consts)


# ----------------------------------------------------------------------------
# NCHW wrapper (PyTorch interface).  The NCHW<->NHWC transposes are pure
# layout plumbing; keep the surrounding network channel-last and call
# self_attn_forward_slab directly to avoid them.
# ----------------------------------------------------------------------------
def self_attn_forward(x_nchw, params, b_blk=None):
    N, C, H, W = x_nchw.shape
    HW = H * W
    folded, qk_pad, wqkv_w = _fold_params(params, C)

    x_slab = (jnp.asarray(x_nchw, jnp.float32)
              .transpose(0, 2, 3, 1).reshape(N, HW, C))
    out = self_attn_forward_slab(x_slab, folded, qk_pad, wqkv_w, b_blk=b_blk)
    return out.reshape(N, H, W, C).transpose(0, 3, 1, 2)


# ----------------------------------------------------------------------------
# Pure-JAX f32 reference (same math as the PyTorch module, inference-mode BN).
# ----------------------------------------------------------------------------
def reference_forward(x, params, eps=1e-5):
    def bn(t, g, b, m, v):
        s = g / jnp.sqrt(v + eps)
        return t * s[None, :, None, None] + (b - m * s)[None, :, None, None]

    def conv1x1(t, w, bias=None):
        y = jnp.einsum('oi,nihw->nohw', jnp.asarray(w, jnp.float32)[:, :, 0, 0], t)
        if bias is not None:
            y = y + jnp.asarray(bias, jnp.float32)[None, :, None, None]
        return y

    shortcut = x                                   # sk=True: identity shortcut
    a = jax.nn.relu(bn(conv1x1(x, params["w_net1"]),
                       params["g1"], params["b1"], params["m1"], params["v1"]))

    Nb, C, H, W = a.shape
    q = conv1x1(a, params["wq"], params["bq"]).reshape(Nb, -1, H * W)   # (N, C8, HW)
    k = conv1x1(a, params["wk"], params["bk"]).reshape(Nb, -1, H * W)
    v = conv1x1(a, params["wv"], params["bv"]).reshape(Nb, -1, H * W)   # (N, C, HW)
    energy = jnp.einsum('nci,ncj->nij', q, k)                           # (N, HW, HW)
    attn = jax.nn.softmax(energy, axis=-1)
    o = jnp.einsum('ncj,nij->nci', v, attn).reshape(Nb, C, H, W)
    att_out = params["gamma"] * o + a                                   # gamma*out + x

    y2 = bn(att_out, params["g2"], params["b2"], params["m2"], params["v2"])
    y3 = bn(conv1x1(jax.nn.relu(y2), params["w_net3"]),
            params["g3"], params["b3"], params["m3"], params["v3"])
    return jax.nn.relu(y3 + shortcut)


# ----------------------------------------------------------------------------
if __name__ == "__main__":
    # dim == dim_out == 32, downsample=False, H = W = 8  (HW = 64), batch = 4
    # -> B_blk = 2 (M = 128 rows per matmul) with 2 "parallel" grid steps.
    N, C, H, W = 4, 32, 8, 8
    C8 = C // 8

    key = jax.random.PRNGKey(0)
    k1, k2, k3, k4, k5, kx = jax.random.split(key, 6)

    def bn_params(Cn, off):
        g = 1.0 + 0.1 * np.arange(Cn, dtype=np.float32) / Cn + off
        b = 0.05 * np.arange(Cn, dtype=np.float32) - off
        m = 0.01 * np.arange(Cn, dtype=np.float32)
        v = 1.0 + 0.02 * np.arange(Cn, dtype=np.float32)
        return g, b, m, v

    g1, b1, m1, v1 = bn_params(C, 0.00)
    g2, b2, m2, v2 = bn_params(C, 0.01)
    # NOTE: mix_bn3 weight is zero-init in the module; trained-like values used
    # here so the whole attention path is exercised by the check.
    g3, b3, m3, v3 = bn_params(C, 0.02)

    params = {
        "w_net1": np.asarray(0.1 * jax.random.normal(k1, (C, C, 1, 1), jnp.float32)),
        "wq": np.asarray(0.1 * jax.random.normal(k2, (C8, C, 1, 1), jnp.float32)),
        "wk": np.asarray(0.1 * jax.random.normal(k3, (C8, C, 1, 1), jnp.float32)),
        "wv": np.asarray(0.1 * jax.random.normal(k4, (C, C, 1, 1), jnp.float32)),
        "bq": 0.01 * np.arange(C8, dtype=np.float32),
        "bk": -0.01 * np.arange(C8, dtype=np.float32),
        "bv": 0.005 * np.arange(C, dtype=np.float32),
        "gamma": 0.7,                       # zero-init in the module; nonzero here
        "w_net3": np.asarray(0.1 * jax.random.normal(k5, (C, C, 1, 1), jnp.float32)),
        "g1": g1, "b1": b1, "m1": m1, "v1": v1,
        "g2": g2, "b2": b2, "m2": m2, "v2": v2,
        "g3": g3, "b3": b3, "m3": m3, "v3": v3,
    }

    x = jax.random.normal(kx, (N, C, H, W), jnp.float32)

    out = jax.block_until_ready(self_attn_forward(x, params))
    ref = jax.block_until_ready(reference_forward(x, params))

    assert out.shape == (N, C, H, W), out.shape
    # bf16 MXU inputs vs f32 reference: keep f32 accumulation, loosen tolerance.
    assert jnp.allclose(out, ref, rtol=3e-2, atol=3e-2), \
        f"max abs diff {float(jnp.max(jnp.abs(out - ref)))}"

    print("KERNEL_OK")
</pallas_src>

<mosaic_0001>
module attributes {stable_mosaic.version = 11 : i64} {
  func.func @_self_attn_kernel(%arg0: i32, %arg1: memref<2x64x32xbf16, #tpu.memory_space<vmem>>, %arg2: memref<32x32xbf16, #tpu.memory_space<vmem>>, %arg3: memref<32x288xbf16, #tpu.memory_space<vmem>>, %arg4: memref<32x32xbf16, #tpu.memory_space<vmem>>, %arg5: memref<8x288xf32, #tpu.memory_space<vmem>>, %arg6: memref<2x64x32xf32, #tpu.memory_space<vmem>>) attributes {dimension_semantics = [#tpu.dimension_semantics<parallel>], iteration_bounds = array<i64: 2>, scalar_prefetch = 0 : i64, scratch_operands = 0 : i64, tpu.core_type = #tpu.core_type<tc>, window_params = [{transform_indices = @transform_0, window_bounds = array<i64: 2, 64, 32>}, {pipeline_mode = #tpu.pipeline_mode<synchronous>, transform_indices = @transform_1, window_bounds = array<i64: 32, 32>}, {pipeline_mode = #tpu.pipeline_mode<synchronous>, transform_indices = @transform_2, window_bounds = array<i64: 32, 288>}, {pipeline_mode = #tpu.pipeline_mode<synchronous>, transform_indices = @transform_3, window_bounds = array<i64: 32, 32>}, {pipeline_mode = #tpu.pipeline_mode<synchronous>, transform_indices = @transform_4, window_bounds = array<i64: 8, 288>}, {transform_indices = @transform_5, window_bounds = array<i64: 2, 64, 32>}]} {
    %c0 = arith.constant 0 : index
    %c0_0 = arith.constant 0 : index
    %c0_1 = arith.constant 0 : index
    %0 = vector.load %arg1[%c0, %c0_0, %c0_1] : memref<2x64x32xbf16, #tpu.memory_space<vmem>>, vector<2x64x32xbf16>
    %1 = vector.shape_cast %0 : vector<2x64x32xbf16> to vector<128x32xbf16>
    %c0_2 = arith.constant 0 : index
    %c0_3 = arith.constant 0 : index
    %2 = vector.load %arg5[%c0_2, %c0_3] : memref<8x288xf32, #tpu.memory_space<vmem>>, vector<8x288xf32>
    %3 = vector.extract_strided_slice %2 {offsets = [0, 0], sizes = [1, 32], strides = [1, 1]} : vector<8x288xf32> to vector<1x32xf32>
    %4 = vector.extract_strided_slice %2 {offsets = [1, 0], sizes = [1, 288], strides = [1, 1]} : vector<8x288xf32> to vector<1x288xf32>
    %5 = vector.extract_strided_slice %2 {offsets = [2, 0], sizes = [1, 32], strides = [1, 1]} : vector<8x288xf32> to vector<1x32xf32>
    %6 = vector.extract_strided_slice %2 {offsets = [3, 0], sizes = [1, 32], strides = [1, 1]} : vector<8x288xf32> to vector<1x32xf32>
    %7 = vector.extract_strided_slice %2 {offsets = [4, 0], sizes = [1, 32], strides = [1, 1]} : vector<8x288xf32> to vector<1x32xf32>
    %8 = vector.extract_strided_slice %2 {offsets = [5, 0], sizes = [1, 32], strides = [1, 1]} : vector<8x288xf32> to vector<1x32xf32>
    %c0_4 = arith.constant 0 : index
    %c0_5 = arith.constant 0 : index
    %9 = vector.load %arg2[%c0_4, %c0_5] : memref<32x32xbf16, #tpu.memory_space<vmem>>, vector<32x32xbf16>
    %cst = arith.constant dense<0.000000e+00> : vector<128x32xf32>
    %10 = tpu.matmul %1, %9, %cst {dimension_numbers = #tpu.dot_dimension_numbers<[1], [0], [0], [1], [0, 0, 1, 1], [], []>} : vector<128x32xbf16>, vector<32x32xbf16>, vector<128x32xf32> -> vector<128x32xf32>
    %11 = vector.broadcast %3 : vector<1x32xf32> to vector<128x32xf32>
    %12 = arith.addf %10, %11 : vector<128x32xf32>
    %cst_6 = arith.constant 0.000000e+00 : f32
    %13 = vector.broadcast %cst_6 : f32 to vector<128x32xf32>
    %14 = arith.maximumf %12, %13 : vector<128x32xf32>
    %15 = arith.truncf %14 : vector<128x32xf32> to vector<128x32xbf16>
    %c0_7 = arith.constant 0 : index
    %c0_8 = arith.constant 0 : index
    %16 = vector.load %arg3[%c0_7, %c0_8] : memref<32x288xbf16, #tpu.memory_space<vmem>>, vector<32x288xbf16>
    %cst_9 = arith.constant dense<0.000000e+00> : vector<128x288xf32>
    %17 = tpu.matmul %15, %16, %cst_9 {dimension_numbers = #tpu.dot_dimension_numbers<[1], [0], [0], [1], [0, 0, 1, 1], [], []>} : vector<128x32xbf16>, vector<32x288xbf16>, vector<128x288xf32> -> vector<128x288xf32>
    %18 = vector.broadcast %4 : vector<1x288xf32> to vector<128x288xf32>
    %19 = arith.addf %17, %18 : vector<128x288xf32>
    %20 = vector.extract_strided_slice %19 {offsets = [0, 0], sizes = [128, 128], strides = [1, 1]} : vector<128x288xf32> to vector<128x128xf32>
    %21 = vector.shape_cast %20 : vector<128x128xf32> to vector<2x64x128xf32>
    %22 = arith.truncf %21 : vector<2x64x128xf32> to vector<2x64x128xbf16>
    %23 = vector.extract_strided_slice %19 {offsets = [0, 128], sizes = [128, 128], strides = [1, 1]} : vector<128x288xf32> to vector<128x128xf32>
    %24 = vector.shape_cast %23 : vector<128x128xf32> to vector<2x64x128xf32>
    %25 = arith.truncf %24 : vector<2x64x128xf32> to vector<2x64x128xbf16>
    %26 = vector.extract_strided_slice %19 {offsets = [0, 256], sizes = [128, 32], strides = [1, 1]} : vector<128x288xf32> to vector<128x32xf32>
    %27 = vector.shape_cast %26 : vector<128x32xf32> to vector<2x64x32xf32>
    %28 = arith.truncf %27 : vector<2x64x32xf32> to vector<2x64x32xbf16>
    "tpu.trace_start"() <{level = 10 : i32, message = "bqc,bkc->bqk"}> : () -> ()
    %cst_10 = arith.constant dense<0.000000e+00> : vector<2x64x64xf32>
    %29 = tpu.matmul %22, %25, %cst_10 {dimension_numbers = #tpu.dot_dimension_numbers<[2], [2], [1], [1], [0, 0, 0, 1, 1, 1], [0], [0]>} : vector<2x64x128xbf16>, vector<2x64x128xbf16>, vector<2x64x64xf32> -> vector<2x64x64xf32>
    "tpu.trace_stop"() : () -> ()
    %cst_11 = arith.constant dense<0xFF800000> : vector<2x64xf32>
    %30 = vector.multi_reduction <maximumf>, %29, %cst_11 [2] : vector<2x64x64xf32> to vector<2x64xf32>
    %31 = vector.shape_cast %30 : vector<2x64xf32> to vector<2x64x1xf32>
    %32 = vector.broadcast %31 : vector<2x64x1xf32> to vector<2x64x64xf32>
    %33 = arith.subf %29, %32 : vector<2x64x64xf32>
    %34 = math.exp %33 : vector<2x64x64xf32>
    %cst_12 = arith.constant dense<0.000000e+00> : vector<2x64xf32>
    %35 = vector.multi_reduction <add>, %34, %cst_12 [2] : vector<2x64x64xf32> to vector<2x64xf32>
    %36 = vector.shape_cast %35 : vector<2x64xf32> to vector<2x64x1xf32>
    %37 = arith.truncf %34 : vector<2x64x64xf32> to vector<2x64x64xbf16>
    "tpu.trace_start"() <{level = 10 : i32, message = "bqk,bkc->bqc"}> : () -> ()
    %cst_13 = arith.constant dense<0.000000e+00> : vector<2x64x32xf32>
    %38 = tpu.matmul %37, %28, %cst_13 {dimension_numbers = #tpu.dot_dimension_numbers<[2], [1], [1], [2], [0, 0, 0, 1, 1, 2], [0], [0]>} : vector<2x64x64xbf16>, vector<2x64x32xbf16>, vector<2x64x32xf32> -> vector<2x64x32xf32>
    "tpu.trace_stop"() : () -> ()
    %39 = tpu.reciprocal %36 {approx = true} : vector<2x64x1xf32> -> vector<2x64x1xf32>
    %40 = vector.broadcast %39 : vector<2x64x1xf32> to vector<2x64x32xf32>
    %41 = arith.mulf %38, %40 : vector<2x64x32xf32>
    %42 = vector.shape_cast %41 : vector<2x64x32xf32> to vector<128x32xf32>
    %43 = vector.broadcast %5 : vector<1x32xf32> to vector<128x32xf32>
    %44 = arith.mulf %42, %43 : vector<128x32xf32>
    %45 = vector.broadcast %6 : vector<1x32xf32> to vector<128x32xf32>
    %46 = arith.mulf %14, %45 : vector<128x32xf32>
    %47 = arith.addf %44, %46 : vector<128x32xf32>
    %48 = vector.broadcast %7 : vector<1x32xf32> to vector<128x32xf32>
    %49 = arith.addf %47, %48 : vector<128x32xf32>
    %cst_14 = arith.constant 0.000000e+00 : f32
    %50 = vector.broadcast %cst_14 : f32 to vector<128x32xf32>
    %51 = arith.maximumf %49, %50 : vector<128x32xf32>
    %52 = arith.truncf %51 : vector<128x32xf32> to vector<128x32xbf16>
    %c0_15 = arith.constant 0 : index
    %c0_16 = arith.constant 0 : index
    %53 = vector.load %arg4[%c0_15, %c0_16] : memref<32x32xbf16, #tpu.memory_space<vmem>>, vector<32x32xbf16>
    %cst_17 = arith.constant dense<0.000000e+00> : vector<128x32xf32>
    %54 = tpu.matmul %52, %53, %cst_17 {dimension_numbers = #tpu.dot_dimension_numbers<[1], [0], [0], [1], [0, 0, 1, 1], [], []>} : vector<128x32xbf16>, vector<32x32xbf16>, vector<128x32xf32> -> vector<128x32xf32>
    %55 = vector.broadcast %8 : vector<1x32xf32> to vector<128x32xf32>
    %56 = arith.addf %54, %55 : vector<128x32xf32>
    %57 = arith.extf %1 : vector<128x32xbf16> to vector<128x32xf32>
    %58 = arith.addf %56, %57 : vector<128x32xf32>
    %cst_18 = arith.constant 0.000000e+00 : f32
    %59 = vector.broadcast %cst_18 : f32 to vector<128x32xf32>
    %60 = arith.maximumf %58, %59 : vector<128x32xf32>
    %61 = vector.shape_cast %60 : vector<128x32xf32> to vector<2x64x32xf32>
    %c0_19 = arith.constant 0 : index
    %c0_20 = arith.constant 0 : index
    %c0_21 = arith.constant 0 : index
    %62 = vector.load %arg6[%c0_19, %c0_20, %c0_21] : memref<2x64x32xf32, #tpu.memory_space<vmem>>, vector<2x64x32xf32>
    tpu.vector_store %arg6[%c0_19, %c0_20, %c0_21], %61 {strides = array<i32>} : memref<2x64x32xf32, #tpu.memory_space<vmem>>, vector<2x64x32xf32>,
    return
  }
  func.func @transform_0(%arg0: i32) -> (i32, i32, i32) {
    %c0_i32 = arith.constant 0 : i32
    %c0_i32_0 = arith.constant 0 : i32
    %c0_i32_1 = arith.constant 0 : i32
    return %arg0, %c0_i32, %c0_i32_0 : i32, i32, i32
  }
  func.func @transform_1(%arg0: i32) -> (i32, i32) {
    %c0_i32 = arith.constant 0 : i32
    %c0_i32_0 = arith.constant 0 : i32
    %c0_i32_1 = arith.constant 0 : i32
    return %c0_i32, %c0_i32_0 : i32, i32
  }
  func.func @transform_2(%arg0: i32) -> (i32, i32) {
    %c0_i32 = arith.constant 0 : i32
    %c0_i32_0 = arith.constant 0 : i32
    %c0_i32_1 = arith.constant 0 : i32
    return %c0_i32, %c0_i32_0 : i32, i32
  }
  func.func @transform_3(%arg0: i32) -> (i32, i32) {
    %c0_i32 = arith.constant 0 : i32
    %c0_i32_0 = arith.constant 0 : i32
    %c0_i32_1 = arith.constant 0 : i32
    return %c0_i32, %c0_i32_0 : i32, i32
  }
  func.func @transform_4(%arg0: i32) -> (i32, i32) {
    %c0_i32 = arith.constant 0 : i32
    %c0_i32_0 = arith.constant 0 : i32
    %c0_i32_1 = arith.constant 0 : i32
    return %c0_i32, %c0_i32_0 : i32, i32
  }
  func.func @transform_5(%arg0: i32) -> (i32, i32, i32) {
    %c0_i32 = arith.constant 0 : i32
    %c0_i32_0 = arith.constant 0 : i32
    %c0_i32_1 = arith.constant 0 : i32
    return %arg0, %c0_i32, %c0_i32_0 : i32, i32, i32
  }
}

</mosaic_0001>

<bundles_post_ra>
// kernel: tpu_custom_call.1
= control target key start
LH: loop header
LB: loop body
LE: loop exit
PB: predicated region body
PF: predicated region fallthrough
CT: control target
= control target key end

     0   :  { %s2013_s18 = smov 0   ;;  %s2542_s0 = inlined_call_operand.vmem [shape: bf16[4,64,32], index: 0, kind: input, shape index: {}]   ;;  %s2543_s1 = inlined_call_operand.vmem [shape: bf16[32,32], index: 1, kind: input, shape index: {}]   ;;  %s2544_s2 = inlined_call_operand.vmem [shape: bf16[32,288], index: 2, kind: input, shape index: {}]   ;;  %s2545_s3 = inlined_call_operand.vmem [shape: bf16[32,32], index: 3, kind: input, shape index: {}]   ;;  %s2546_s4 = inlined_call_operand.vmem [shape: f32[8,288], index: 4, kind: input, shape index: {}]   ;;  %s2547_s5 = inlined_call_operand.vmem [shape: f32[4,64,32], index: 5, kind: output, shape index: {}]  }
   0x1 LB: > { %s1601_s19 = sadd.s32 4294967295, %s1980_s18   ;;  %p1605_p0 = scmp.ge.s32.totalorder %s1980_s18, 1  ;;  %s1980_s18 = sphi %s2013_s18, %s15_s18  }
   0x2   : > { %p189_p1 = scmp.lt.s32.totalorder %s1980_s18, 3 }
   0x4   : > { %p190_p2 = pnand %p1605_p0, %p189_p1 }
   0x5   : > { %v1873_v0 = vld [vmem:[%s2543_s1] sm:$0xff] (!%p190_p2)   ;;  %s1606_s22 = sshll.u32 (!%p190_p2), %s1601_s19, 1  ;;  %v1874_v1 = vld [vmem:[%s2543_s1 + $0x8] sm:$0xff] (!%p190_p2)   ;;  %vm313_vm0 = vcmask (!%p190_p2), 261120   ;;  %v1982_v16 = vmov (!%p190_p2), 0   ;;  %v257_v17 = vlaneseq (!%p190_p2)  ;;  %vm899_vm1 = vcmask (!%p190_p2), 523264  }
   0x6   : > { %193 = sbr.rel (%p190_p2) target bundleno = 1359 (0x54f), region = 40  ;;  %p220_p3 = scmp.lt.s32.totalorder (!%p190_p2), %s1606_s22, 3  ;;  %1736 = vmatprep.subr.bf16.mxu0 (!%p190_p2), %v1873_v0  ;;  %1860 = vmatprep.subr.bf16.mxu1 (!%p190_p2), %v1873_v0  ;;  %v1885_v10 = vld [vmem:[%s2544_s2 + $0x4] ss:$12 sps:$4 sm:$0xff] (!%p190_p2)   ;;  %v1883_v11 = vld [vmem:[%s2544_s2] ss:$12 sps:$4 sm:$0xff] (!%p190_p2)  }
   0x7   : > { %1737 = vmatpush3.bf16.msra.mxu0 (!%p190_p2), %v1873_v0  ;;  %1862 = vmatpush3.bf16.msra.mxu1 (!%p190_p2), %v1873_v0  ;;  %v1886_v12 = vld [vmem:[%s2544_s2 + $0x8] ss:$12 sps:$4 sm:$0xff] (!%p190_p2)   ;;  %v1887_v14 = vld [vmem:[%s2544_s2 + $0x18] ss:$12 sps:$4 sm:$0xff] (!%p190_p2)   ;;  %v1890_v15 = vld [vmem:[%s2544_s2 + $0x20] ss:$12 sps:$4 sm:$0xff] (!%p190_p2)  }
   0x8   : > { %1738 = vmatprep.subr.bf16.mxu0 (!%p190_p2), %v1874_v1  ;;  %1861 = vmatprep.subr.bf16.mxu1 (!%p190_p2), %v1874_v1  ;;  %v1889_v13 = vld [vmem:[%s2544_s2 + $0x1c] ss:$12 sps:$4 sm:$0xff] (!%p190_p2)   ;;  %v2070_v18 = vshrl.u32 (!%p190_p2), %v257_v17, 7  ;;  %v2076_v20 = vld [vmem:[%s2546_s4] sm:$0xff] (!%p190_p2)  ;;  %v252_v17 = vld [vmem:[%s2546_s4 + $0x10] sm:$0xff] (!%p190_p2) }
   0xa   : > { %v259_v19 = vsub.s32 (!%p190_p2), 0, %v2070_v18 }
   0xb   : > { %1739 = vmatpush3.bf16.msra.mxu0 (!%p190_p2), %v1874_v1  ;;  %1863 = vmatpush3.bf16.msra.mxu1 (!%p190_p2), %v1874_v1 }
   0xc   : > { %535 = vmatprep.subr.bf16.mxu1 (!%p190_p2), %v1885_v10  ;;  %1756 = vmatprep.subr.bf16.mxu0 (!%p190_p2), %v1886_v12  ;;  %v260_v21 = vrot.slane (!%p190_p2), %v2076_v20, %v259_v19 }
   0xd   : > { %s2555_s22 = smov (!%p220_p3, %s1606_s22), 3 }
   0xe   : > { %s1672_s25 = sshll.u32 %s2555_s22, 5  ;;  %s1673_s6 = sshll.u32 %s2555_s22, 6 }
   0xf   : > { %s2033_s28 = scalar_lea.vmem %s2542_s0, %s1672_s25  ;;  %s2486_s9 = scalar_lea.vmem %s2547_s5, %s1673_s6 }
  0x10   : > { %v234_v2 = vld [vmem:[%s2033_s28] sm:$0xff]   ;;  %v236_v3 = vld [vmem:[%s2033_s28 + $0x8] sm:$0xff]   ;;  %v238_v4 = vld [vmem:[%s2033_s28 + $0x10] sm:$0xff]  }
  0x11   : > { %v242_v5 = vld [vmem:[%s2033_s28 + $0x20] sm:$0xff]   ;;  %v244_v6 = vld [vmem:[%s2033_s28 + $0x28] sm:$0xff]   ;;  %v246_v7 = vld [vmem:[%s2033_s28 + $0x30] sm:$0xff]   ;;  %1740 = vmatprep.mubr.msk.bf16.mxu0 %vm313_vm0, %v234_v2 }
  0x12   : > { %1741 = vmatmul.mubr.msk.bf16.vlgmr.msra.gmra.mrb[0].mxu0 %vm313_vm0, %v236_v3  ;;  %1748 = vmatprep.mubr.msk.bf16.mxu1 %vm313_vm0, %v242_v5  ;;  %v240_v8 = vld [vmem:[%s2033_s28 + $0x18] sm:$0xff]  }
  0x13   : > { %1744 = vmatprep.mubr.msk.bf16.mxu0 %vm313_vm0, %v238_v4  ;;  %1749 = vmatmul.mubr.msk.bf16.vlgmr.msra.gmra.mrb[0].mxu1 %vm313_vm0, %v244_v6  ;;  %v248_v9 = vld [vmem:[%s2033_s28 + $0x38] sm:$0xff]  }
  0x14   : > { %1752 = vmatprep.mubr.msk.bf16.mxu1 %vm313_vm0, %v246_v7  ;;  %536 = vmatpush1.bf16.msra.mxu1 %v1883_v11 }
  0x15   : > { %1757 = vmatpush3.bf16.msra.mxu0 %v1886_v12  ;;  %537 = vmatprep.subr.bf16.mxu1 %v1889_v13 }
  0x16   : > { %1758 = vmatprep.subr.bf16.mxu0 %v1890_v15 }
  0x18   : > { %538 = vmatpush1.bf16.msra.mxu1 %v1887_v14  ;;  %v469_v14 = vsub.s32 1, %v2070_v18 }
  0x19   : > { %1759 = vmatpush3.bf16.msra.mxu0 %v1890_v15  ;;  %v251_v15 = vld [vmem:[%s2546_s4 + $0x8] sm:$0xff] }
  0x1a   : > { %1745 = vmatmul.mubr.msk.bf16.gmra.mrb[4].mxu0 %vm313_vm0, %v240_v8  ;;  %v2190_v19 = vrot.slane %v2076_v20, %v469_v14 }
  0x1b   : > { %1753 = vmatmul.mubr.msk.bf16.gmra.mrb[4].mxu1 %vm313_vm0, %v248_v9 }
  0x1c   : > { %567 = vmatprep.mubr.bf16.mxu1 %v1982_v16 }
  0xe5   : > { %v1742_v22 = vpop.f32.mrb[0].mxu0 }
  0xe6   : > { %v2079_v23 = vadd.f32 %v1742_v22, %v260_v21  ;;  %v372_v24 = vpop.f32.mrb[1].mxu0  ;;  %v1750_v25 = vpop.f32.mrb[0].mxu1  ;;  %v2192_v22 = vrot.slane %v251_v15, %v469_v14 }
  0xe7   : > { %v2081_v26 = vadd.f32 %v372_v24, %v260_v21  ;;  %v1743_v27 = vpop.f32.mrb[2].mxu0  ;;  %v2083_v28 = vadd.f32 %v1750_v25, %v260_v21  ;;  %v404_v29 = vpop.f32.mrb[1].mxu1  ;;  %v2194_v24 = vrot.slane %v252_v17, %v469_v14 }
  0xe8   : > { %v2085_v30 = vadd.f32 %v1743_v27, %v260_v21  ;;  %v375_v31 = vpop.f32.mrb[3].mxu0  ;;  %v2087_v32 = vadd.f32 %v404_v29, %v260_v21  ;;  %v1751_v33 = vpop.f32.mrb[2].mxu1  ;;  %v437_v38 = vmax.f32 %v2079_v23, 0.0 }
  0xe9   : > { %v2089_v34 = vadd.f32 %v375_v31, %v260_v21  ;;  %v445_v35 = vmax.f32 %v2083_v28, 0.0  ;;  %v2092_v36 = vadd.f32 %v1751_v33, %v260_v21  ;;  %v407_v37 = vpop.f32.mrb[3].mxu1  ;;  %v435_v42 = vmax.f32 %v2081_v26, 0.0 }
  0xea   : > { %v438_v39 = vmax.f32 %v2085_v30, 0.0  ;;  %v443_v40 = vmax.f32 %v2087_v32, 0.0  ;;  %v2097_v41 = vadd.f32 %v407_v37, %v260_v21 }
  0xeb   : > { %v436_v43 = vmax.f32 %v2089_v34, 0.0  ;;  %v446_v44 = vmax.f32 %v2092_v36, 0.0 }
  0xec   : > { %v452_v45 = vpack.c.bf16 %v438_v39, %v437_v38  ;;  %v444_v46 = vmax.f32 %v2097_v41, 0.0 }
  0xed   : > { %v451_v47 = vpack.c.bf16 %v436_v43, %v435_v42  ;;  %v1746_v48 = vpop.f32.mrb[4].mxu0  ;;  %v456_v49 = vpack.c.bf16 %v446_v44, %v445_v35 }
  0xee   : > { %v2115_v50 = vadd.f32 %v1746_v48, %v260_v21  ;;  %v388_v51 = vpop.f32.mrb[5].mxu0  ;;  %v455_v52 = vpack.c.bf16 %v444_v46, %v443_v40  ;;  %v1754_v53 = vpop.f32.mrb[4].mxu1 }
  0xef   : > { %v2121_v54 = vadd.f32 %v388_v51, %v260_v21  ;;  %1636 = vmatmul.mubr.msk.bf16.vlgmr.msra.gmra.mrb[8].mxu1 %vm313_vm0, %v451_v47  ;;  %1760 = vmatprep.mubr.msk.bf16.mxu0 %vm313_vm0, %v451_v47  ;;  %v1747_v55 = vpop.f32.mrb[6].mxu0  ;;  %v2125_v56 = vadd.f32 %v1754_v53, %v260_v21  ;;  %v420_v57 = vpop.f32.mrb[5].mxu1 }
  0xf0   : > { %v441_v58 = vmax.f32 %v2115_v50, 0.0  ;;  %v2128_v59 = vadd.f32 %v1747_v55, %v260_v21  ;;  %1761 = vmatmul.mubr.msk.bf16.vlgmr.msra.gmra.mrb[8].mxu0 %vm313_vm0, %v452_v45  ;;  %v391_v60 = vpop.f32.mrb[7].mxu0  ;;  %577 = vmatprep.mubr.bf16.mxu1 %v1982_v16  ;;  %v2132_v61 = vadd.f32 %v420_v57, %v260_v21  ;;  %v1755_v62 = vpop.f32.mrb[6].mxu1 }
  0xf1   : > { %v439_v63 = vmax.f32 %v2121_v54, 0.0  ;;  %v2135_v0 = vadd.f32 %v391_v60, %v260_v21  ;;  %v449_v1 = vmax.f32 %v2125_v56, 0.0  ;;  %v2138_v2 = vadd.f32 %v1755_v62, %v260_v21  ;;  %v423_v3 = vpop.f32.mrb[7].mxu1 }
  0xf2   : > { %v442_v4 = vmax.f32 %v2128_v59, 0.0  ;;  %v2550_v5 = vmax.f32 %v2132_v61, 0.0  ;;  %v2142_v6 = vadd.f32 %v423_v3, %v260_v21 }
  0xf3   : > { %v440_v7 = vmax.f32 %v2135_v0, 0.0  ;;  %v2549_v8 = vmax.f32 %v2138_v2, 0.0 }
  0xf4   : > { %v454_v9 = vpack.c.bf16 %v442_v4, %v441_v58  ;;  %v2548_v10 = vmax.f32 %v2142_v6, 0.0 }
  0xf5   : > { %v453_v11 = vpack.c.bf16 %v440_v7, %v439_v63  ;;  %v458_v12 = vpack.c.bf16 %v2549_v8, %v449_v1 }
  0xf6   : > { %v457_v13 = vpack.c.bf16 %v2548_v10, %v2550_v5 }
  0xf7   : > { %1637 = vmatmul.mubr.msk.bf16.gmra.mrb[12].mxu1 %vm313_vm0, %v452_v45  ;;  %1764 = vmatprep.mubr.msk.bf16.mxu0 %vm313_vm0, %v453_v11 }
  0xf8   : > { %1765 = vmatmul.mubr.msk.bf16.gmra.mrb[12].mxu0 %vm313_vm0, %v454_v9  ;;  %587 = vmatprep.mubr.bf16.mxu1 %v1982_v16 }
  0xf9   : > { %1768 = vmatprep.mubr.msk.bf16.mxu0 %vm313_vm0, %v455_v52 }
  0xff   : > { %1638 = vmatmul.mubr.msk.bf16.gmra.mrb[16].mxu1 %vm313_vm0, %v453_v11 }
 0x100   : > { %597 = vmatprep.mubr.bf16.mxu1 %v1982_v16  ;;  %1769 = vmatmul.mubr.msk.bf16.gmra.mrb[16].mxu0 %vm313_vm0, %v456_v49 }
 0x101   : > { %1772 = vmatprep.mubr.msk.bf16.mxu0 %vm313_vm0, %v457_v13 }
 0x107   : > { %1639 = vmatmul.mubr.msk.bf16.gmra.mrb[20].mxu1 %vm313_vm0, %v454_v9 }
 0x108   : > { %607 = vmatprep.mubr.bf16.mxu1 %v1982_v16  ;;  %1773 = vmatmul.mubr.msk.bf16.gmra.mrb[20].mxu0 %vm313_vm0, %v458_v12 }
 0x10f   : > { %1640 = vmatmul.mubr.msk.bf16.gmra.mrb[24].mxu1 %vm313_vm0, %v455_v52 }
 0x110   : > { %617 = vmatprep.mubr.bf16.mxu1 %v1982_v16 }
 0x117   : > { %1641 = vmatmul.mubr.msk.bf16.gmra.mrb[28].mxu1 %vm313_vm0, %v456_v49 }
 0x118   : > { %627 = vmatprep.mubr.bf16.mxu1 %v1982_v16 }
 0x11f   : > { %1642 = vmatmul.mubr.msk.bf16.gmra.mrb[32].mxu1 %vm313_vm0, %v457_v13 }
 0x120   : > { %637 = vmatprep.mubr.bf16.mxu1 %v1982_v16 }
 0x127   : > { %1643 = vmatmul.mubr.msk.bf16.gmra.mrb[36].mxu1 %vm313_vm0, %v458_v12 }
 0x1c2   : > { %v569_v21 = vpop.f32.mrb[8].mxu1 }
 0x1c3   : > { %v571_v16 = vpop.f32.mrb[9].mxu1  ;;  %v1762_v25 = vpop.f32.mrb[8].mxu0  ;;  %v570_v31 = vadd.f32 %v569_v21, %v2190_v19 }
 0x1c4   : > { %v573_v27 = vpop.f32.mrb[10].mxu1  ;;  %v682_v29 = vpop.f32.mrb[9].mxu0  ;;  %v572_v47 = vadd.f32 %v571_v16, %v2192_v22  ;;  %v691_v48 = vadd.f32 %v1762_v25, %v2194_v24 }
 0x1c5   : > { %v574_v33 = vadd.f32 %v573_v27, %v2190_v19  ;;  %v575_v37 = vpop.f32.mrb[11].mxu1  ;;  %v1763_v45 = vpop.f32.mrb[10].mxu0  ;;  %v683_v55 = vadd.f32 %v682_v29, %v2194_v24 }
 0x1c6   : > { %v576_v49 = vadd.f32 %v575_v37, %v2192_v22  ;;  %v694_v51 = vadd.f32 %v1763_v45, %v2194_v24  ;;  %v685_v52 = vpop.f32.mrb[11].mxu0 }
 0x1c7   : > { %v745_v53 = vpack.c.bf16 %v574_v33, %v570_v31  ;;  %v686_v57 = vadd.f32 %v685_v52, %v2194_v24 }
 0x1c8   : > { %v753_v60 = vpack.c.bf16 %v576_v49, %v572_v47  ;;  %v2204_v62 = vpack.c.bf16 %v694_v51, %v691_v48 }
 0x1c9   : > { %v2206_v3 = vpack.c.bf16 %v686_v57, %v683_v55  ;;  %1784 = vmatprep.mubr.bf16.mxu0 %v745_v53 }
 0x1ca   : > { %v579_v9 = vpop.f32.mrb[12].mxu1  ;;  %1776 = vmatprep.subr.bf16.mxu0 %v753_v60 }
 0x1cb   : > { %v581_v11 = vpop.f32.mrb[13].mxu1  ;;  %1777 = vmatpush3.bf16.xpose.msra.mxu0 %v753_v60  ;;  %v1766_v12 = vpop.f32.mrb[12].mxu0  ;;  %v2210_v17 = vadd.f32 %v579_v9, %v2190_v19 }
 0x1cc   : > { %v583_v13 = vpop.f32.mrb[14].mxu1  ;;  %v707_v14 = vadd.f32 %v1766_v12, %v2194_v24  ;;  %v698_v15 = vpop.f32.mrb[13].mxu0  ;;  %v582_v29 = vadd.f32 %v581_v11, %v2192_v22 }
 0x1cd   : > { %v2213_v21 = vadd.f32 %v583_v13, %v2190_v19  ;;  %v585_v16 = vpop.f32.mrb[15].mxu1  ;;  %v699_v25 = vadd.f32 %v698_v15, %v2194_v24  ;;  %v1767_v27 = vpop.f32.mrb[14].mxu0 }
 0x1ce   : > { %v586_v31 = vadd.f32 %v585_v16, %v2192_v22  ;;  %v710_v33 = vadd.f32 %v1767_v27, %v2194_v24  ;;  %v701_v37 = vpop.f32.mrb[15].mxu0 }
 0x1cf   : > { %v746_v45 = vpack.c.bf16 %v2213_v21, %v2210_v17  ;;  %v702_v47 = vadd.f32 %v701_v37, %v2194_v24 }
 0x1d0   : > { %v754_v48 = vpack.c.bf16 %v586_v31, %v582_v29  ;;  %v2222_v49 = vpack.c.bf16 %v710_v33, %v707_v14 }
 0x1d1   : > { %v2224_v51 = vpack.c.bf16 %v702_v47, %v699_v25 }
 0x1d2   : > { %v589_v52 = vpop.f32.mrb[16].mxu1  ;;  %1778 = vmatprep.subr.bf16.mxu0 %v754_v48 }
 0x1d3   : > { %v591_v53 = vpop.f32.mrb[17].mxu1  ;;  %1779 = vmatpush3.bf16.xpose.msra.mxu0 %v754_v48  ;;  %v1770_v55 = vpop.f32.mrb[16].mxu0  ;;  %v590_v11 = vadd.f32 %v589_v52, %v2190_v19 }
 0x1d4   : > { %v593_v57 = vpop.f32.mrb[18].mxu1  ;;  %v723_v60 = vadd.f32 %v1770_v55, %v2194_v24  ;;  %v714_v9 = vpop.f32.mrb[17].mxu0  ;;  %v592_v16 = vadd.f32 %v591_v53, %v2192_v22 }
 0x1d5   : > { %v594_v12 = vadd.f32 %v593_v57, %v2190_v19  ;;  %v595_v13 = vpop.f32.mrb[19].mxu1  ;;  %v715_v15 = vadd.f32 %v714_v9, %v2194_v24  ;;  %v1771_v14 = vpop.f32.mrb[18].mxu0 }
 0x1d6   : > { %v596_v25 = vadd.f32 %v595_v13, %v2192_v22  ;;  %v726_v27 = vadd.f32 %v1771_v14, %v2194_v24  ;;  %v717_v29 = vpop.f32.mrb[19].mxu0 }
 0x1d7   : > { %v747_v31 = vpack.c.bf16 %v594_v12, %v590_v11  ;;  %v718_v33 = vadd.f32 %v717_v29, %v2194_v24 }
 0x1d8   : > { %v755_v37 = vpack.c.bf16 %v596_v25, %v592_v16  ;;  %v2234_v47 = vpack.c.bf16 %v726_v27, %v723_v60 }
 0x1d9   : > { %v2236_v48 = vpack.c.bf16 %v718_v33, %v715_v15 }
 0x1da   : > { %v599_v52 = vpop.f32.mrb[20].mxu1  ;;  %1780 = vmatprep.subr.bf16.mxu0 %v755_v37 }
 0x1db   : > { %v601_v55 = vpop.f32.mrb[21].mxu1  ;;  %1781 = vmatpush3.bf16.xpose.msra.mxu0 %v755_v37  ;;  %v1774_v57 = vpop.f32.mrb[20].mxu0  ;;  %v600_v14 = vadd.f32 %v599_v52, %v2190_v19 }
 0x1dc   : > { %v603_v9 = vpop.f32.mrb[22].mxu1  ;;  %v739_v53 = vadd.f32 %v1774_v57, %v2194_v24  ;;  %v730_v13 = vpop.f32.mrb[21].mxu0  ;;  %v602_v15 = vadd.f32 %v601_v55, %v2192_v22 }
 0x1dd   : > { %v604_v11 = vadd.f32 %v603_v9, %v2190_v19  ;;  %v605_v12 = vpop.f32.mrb[23].mxu1  ;;  %v731_v16 = vadd.f32 %v730_v13, %v2194_v24  ;;  %v1775_v60 = vpop.f32.mrb[22].mxu0 }
 0x1de   : > { %v606_v25 = vadd.f32 %v605_v12, %v2192_v22  ;;  %v742_v27 = vadd.f32 %v1775_v60, %v2194_v24  ;;  %v733_v29 = vpop.f32.mrb[23].mxu0 }
 0x1df   : > { %v748_v33 = vpack.c.bf16 %v604_v11, %v600_v14  ;;  %v734_v37 = vadd.f32 %v733_v29, %v2194_v24 }
 0x1e0   : > { %v756_v57 = vpack.c.bf16 %v606_v25, %v602_v15  ;;  %v2246_v10 = vpack.c.bf16 %v742_v27, %v739_v53 }
 0x1e1   : > { %v2248_v52 = vpack.c.bf16 %v734_v37, %v731_v16 }
 0x1e2   : > { %v609_v9 = vpop.f32.mrb[24].mxu1  ;;  %1782 = vmatprep.subr.bf16.mxu0 %v756_v57 }
 0x1e3   : > { %v611_v8 = vpop.f32.mrb[25].mxu1  ;;  %1783 = vmatpush3.bf16.xpose.msra.mxu0 %v756_v57  ;;  %v610_v55 = vadd.f32 %v609_v9, %v2190_v19 }
 0x1e4   : > { %v613_v13 = vpop.f32.mrb[26].mxu1  ;;  %1808 = vmatprep.subr.bf16.mxu0 %v2206_v3  ;;  %v612_v14 = vadd.f32 %v611_v8, %v2192_v22 }
 0x1e5   : > { %v614_v12 = vadd.f32 %v613_v13, %v2190_v19  ;;  %v615_v60 = vpop.f32.mrb[27].mxu1 }
 0x1e6   : > { %v616_v24 = vadd.f32 %v615_v60, %v2192_v22 }
 0x1e7   : > { %v749_v53 = vpack.c.bf16 %v614_v12, %v610_v55 }
 0x1e8   : > { %v757_v11 = vpack.c.bf16 %v616_v24, %v612_v14 }
 0x1e9   : > { %1800 = vmatprep.mubr.bf16.mxu1 %v749_v53 }
 0x1ea   : > { %v619_v16 = vpop.f32.mrb[28].mxu1  ;;  %1785 = vmatmul.mubr.bf16.vlgmr.msra.gmra.mrb[24].mxu0 %v746_v45  ;;  %1792 = vmatprep.subr.bf16.mxu1 %v757_v11 }
 0x1eb   : > { %v620_v15 = vadd.f32 %v619_v16, %v2190_v19  ;;  %v621_v25 = vpop.f32.mrb[29].mxu1  ;;  %1788 = vmatprep.mubr.bf16.mxu0 %v747_v31  ;;  %1793 = vmatpush3.bf16.xpose.msra.mxu1 %v757_v11 }
 0x1ec   : > { %1809 = vmatpush3.bf16.msra.mxu0 %v2206_v3  ;;  %v623_v27 = vpop.f32.mrb[30].mxu1  ;;  %v622_v37 = vadd.f32 %v621_v25, %v2192_v22 }
 0x1ed   : > { %v624_v8 = vadd.f32 %v623_v27, %v2190_v19  ;;  %1810 = vmatprep.subr.bf16.mxu0 %v2204_v62  ;;  %v625_v29 = vpop.f32.mrb[31].mxu1 }
 0x1ee   : > { %v626_v57 = vadd.f32 %v625_v29, %v2192_v22 }
 0x1ef   : > { %v750_v17 = vpack.c.bf16 %v624_v8, %v620_v15 }
 0x1f0   : > { %v758_v21 = vpack.c.bf16 %v626_v57, %v622_v37  ;;  %1811 = vmatpush3.bf16.msra.mxu0 %v2204_v62 }
 0x1f1   : > { %1812 = vmatprep.subr.bf16.mxu0 %v2224_v51 }
 0x1f2   : > { %v629_v45 = vpop.f32.mrb[32].mxu1  ;;  %1789 = vmatmul.mubr.bf16.gmra.mrb[28].mxu0 %v748_v33  ;;  %1794 = vmatprep.subr.bf16.mxu1 %v758_v21 }
 0x1f3   : > { %v630_v3 = vadd.f32 %v629_v45, %v2190_v19  ;;  %v631_v31 = vpop.f32.mrb[33].mxu1  ;;  %1795 = vmatpush3.bf16.xpose.msra.mxu1 %v758_v21 }
 0x1f4   : > { %1813 = vmatpush3.bf16.msra.mxu0 %v2224_v51  ;;  %v633_v9 = vpop.f32.mrb[34].mxu1  ;;  %v632_v12 = vadd.f32 %v631_v31, %v2192_v22 }
 0x1f5   : > { %v634_v13 = vadd.f32 %v633_v9, %v2190_v19  ;;  %1814 = vmatprep.subr.bf16.mxu0 %v2222_v49  ;;  %v635_v55 = vpop.f32.mrb[35].mxu1 }
 0x1f6   : > { %v636_v62 = vadd.f32 %v635_v55, %v2192_v22 }
 0x1f7   : > { %v751_v60 = vpack.c.bf16 %v634_v13, %v630_v3 }
 0x1f8   : > { %v759_v14 = vpack.c.bf16 %v636_v62, %v632_v12  ;;  %1815 = vmatpush3.bf16.msra.mxu0 %v2222_v49 }
 0x1fa   : > { %v639_v33 = vpop.f32.mrb[36].mxu1  ;;  %1796 = vmatprep.subr.bf16.mxu1 %v759_v14 }
 0x1fb   : > { %v640_v24 = vadd.f32 %v639_v33, %v2190_v19  ;;  %v641_v53 = vpop.f32.mrb[37].mxu1  ;;  %1797 = vmatpush3.bf16.xpose.msra.mxu1 %v759_v14 }
 0x1fc   : > { %v643_v51 = vpop.f32.mrb[38].mxu1  ;;  %v642_v15 = vadd.f32 %v641_v53, %v2192_v22 }
 0x1fd   : > { %v644_v11 = vadd.f32 %v643_v51, %v2190_v19  ;;  %v645_v16 = vpop.f32.mrb[39].mxu1 }
 0x1fe   : > { %v646_v25 = vadd.f32 %v645_v16, %v2192_v22 }
 0x1ff   : > { %v752_v27 = vpack.c.bf16 %v644_v11, %v640_v24 }
 0x200   : > { %v760_v8 = vpack.c.bf16 %v646_v25, %v642_v15 }
 0x202   : > { %1798 = vmatprep.subr.bf16.mxu1 %v760_v8 }
 0x203   : > { %1799 = vmatpush3.bf16.xpose.msra.mxu1 %v760_v8 }
 0x204   : > { %1824 = vmatprep.subr.bf16.mxu1 %v2236_v48 }
 0x20a   : > { %1801 = vmatmul.mubr.bf16.vlgmr.msra.gmra.mrb[40].mxu1 %v750_v17 }
 0x20b   : > { %1804 = vmatprep.mubr.bf16.mxu1 %v751_v60  ;;  %1825 = vmatpush3.bf16.msra.mxu1 %v2236_v48 }
 0x20c   : > { %1826 = vmatprep.subr.bf16.mxu1 %v2234_v47 }
 0x20f   : > { %1827 = vmatpush3.bf16.msra.mxu1 %v2234_v47 }
 0x210   : > { %1828 = vmatprep.subr.bf16.mxu1 %v2248_v52 }
 0x212   : > { %1805 = vmatmul.mubr.bf16.gmra.mrb[44].mxu1 %v752_v27 }
 0x213   : > { %1829 = vmatpush3.bf16.msra.mxu1 %v2248_v52 }
 0x214   : > { %1830 = vmatprep.subr.bf16.mxu1 %v2246_v10 }
 0x217   : > { %1831 = vmatpush3.bf16.msra.mxu1 %v2246_v10 }
 0x2bd   : > { %v1786_v19 = vpop.f32.mrb[24].mxu0 }
 0x2be   : > { %v803_v22 = vpop.f32.mrb[25].mxu0  ;;  %v906_v49 = vsel %vm899_vm1, %v1786_v19, -inf }
 0x2bf   : > { %907 = vmax.xlane.f32.xlu1 %v906_v49  ;;  %v1787_v48 = vpop.f32.mrb[26].mxu0  ;;  %v900_v29 = vsel %vm899_vm1, %v803_v22, -inf }
 0x2c0   : > { %901 = vmax.xlane.f32.xlu0 %v900_v29  ;;  %v806_v47 = vpop.f32.mrb[27].mxu0  ;;  %v909_v37 = vsel %vm899_vm1, %v1787_v48, -inf }
 0x2c1   : > { %v903_v52 = vsel %vm899_vm1, %v806_v47, -inf }
 0x2c3   : > { %910 = vmax.xlane.f32.xlu1 %v909_v37 }
 0x2c4   : > { %904 = vmax.xlane.f32.xlu0 %v903_v52 }
 0x2c5   : > { %v2289_v57 = vpop.f32.mrb[28].mxu0 }
 0x2c6   : > { %v819_v10 = vpop.f32.mrb[29].mxu0  ;;  %v918_v31 = vsel %vm899_vm1, %v2289_v57, -inf }
 0x2c7   : > { %v2291_v17 = vpop.f32.mrb[30].mxu0  ;;  %v912_v21 = vsel %vm899_vm1, %v819_v10, -inf }
 0x2c8   : > { %913 = vmax.xlane.f32.xlu0 %v912_v21  ;;  %v822_v45 = vpop.f32.mrb[31].mxu0  ;;  %v921_v9 = vsel %vm899_vm1, %v2291_v17, -inf }
 0x2c9   : > { %v915_v3 = vsel %vm899_vm1, %v822_v45, -inf }
 0x2ca   : > { %916 = vmax.xlane.f32.xlu1 %v915_v3 }
 0x2cc   : > { %919 = vmax.xlane.f32.xlu0 %v918_v31 }
 0x2ce   : > { %922 = vmax.xlane.f32.xlu1 %v921_v9 }
 0x2dd   : > { %v2299_v13 = vpop.f32.mrb[40].mxu1 }
 0x2de   : > { %v2301_v55 = vpop.f32.mrb[41].mxu1  ;;  %v930_v33 = vsel %vm899_vm1, %v2299_v13, -inf }
 0x2df   : > { %v2303_v12 = vpop.f32.mrb[42].mxu1  ;;  %v924_v62 = vsel %vm899_vm1, %v2301_v55, -inf }
 0x2e0   : > { %v2307_v60 = vpop.f32.mrb[43].mxu1  ;;  %925 = vmax.xlane.f32.xlu0 %v924_v62  ;;  %v933_v53 = vsel %vm899_vm1, %v2303_v12, -inf }
 0x2e1   : > { %v927_v14 = vsel %vm899_vm1, %v2307_v60, -inf }
 0x2e2   : > { %928 = vmax.xlane.f32.xlu1 %v927_v14 }
 0x2e4   : > { %931 = vmax.xlane.f32.xlu0 %v930_v33 }
 0x2e5   : > { %v2313_v24 = vpop.f32.mrb[44].mxu1 }
 0x2e6   : > { %v2317_v51 = vpop.f32.mrb[45].mxu1  ;;  %934 = vmax.xlane.f32.xlu1 %v933_v53  ;;  %v942_v27 = vsel %vm899_vm1, %v2313_v24, -inf }
 0x2e7   : > { %v2319_v11 = vpop.f32.mrb[46].mxu1  ;;  %v936_v16 = vsel %vm899_vm1, %v2317_v51, -inf }
 0x2e8   : > { %v2323_v15 = vpop.f32.mrb[47].mxu1  ;;  %937 = vmax.xlane.f32.xlu0 %v936_v16  ;;  %v945_v8 = vsel %vm899_vm1, %v2319_v11, -inf }
 0x2e9   : > { %v939_v25 = vsel %vm899_vm1, %v2323_v15, -inf }
 0x2ea   : > { %940 = vmax.xlane.f32.xlu1 %v939_v25 }
 0x2ec   : > { %943 = vmax.xlane.f32.xlu0 %v942_v27 }
 0x2ee   : > { %946 = vmax.xlane.f32.xlu1 %v945_v8 }
 0x34c   : > { %v908_v49 = vpop.xlane.xlu1 %907 }
 0x34d   : > { %v950_v29 = vsub.f32 %v1786_v19, %v908_v49  ;;  %v902_v37 = vpop.xlane.xlu0 %901 }
 0x34e   : > { %v948_v52 = vsub.f32 %v803_v22, %v902_v37 }
 0x34f   : > { %v968_v21 = vmul.f32 1.442695, %v950_v29 }
 0x350   : > { %v964_v3 = vmul.f32 1.442695, %v948_v52  ;;  %v911_v31 = vpop.xlane.xlu1 %910 }
 0x351   : > { %v951_v9 = vsub.f32 %v1787_v48, %v911_v31  ;;  %v905_v62 = vpop.xlane.xlu0 %904 }
 0x352   : > { %1901 = vpow2.f32 %v964_v3  ;;  %v949_v14 = vsub.f32 %v806_v47, %v905_v62 }
 0x353   : > { %v970_v33 = vmul.f32 1.442695, %v951_v9  ;;  %1903 = vpow2.f32 %v968_v21 }
 0x354   : > { %v966_v53 = vmul.f32 1.442695, %v949_v14 }
 0x355   : > { %1905 = vpow2.f32 %v970_v33  ;;  %v914_v16 = vpop.xlane.xlu0 %913 }
 0x356   : > { %1907 = vpow2.f32 %v966_v53  ;;  %v952_v25 = vsub.f32 %v819_v10, %v914_v16 }
 0x357   : > { %v917_v27 = vpop.xlane.xlu1 %916 }
 0x358   : > { %v972_v8 = vmul.f32 1.442695, %v952_v25  ;;  %v953_v5 = vsub.f32 %v822_v45, %v917_v27 }
 0x359   : > { %v920_v19 = vpop.xlane.xlu0 %919 }
 0x35a   : > { %1909 = vpow2.f32 %v972_v8  ;;  %v974_v22 = vmul.f32 1.442695, %v953_v5  ;;  %v954_v49 = vsub.f32 %v2289_v57, %v920_v19 }
 0x35b   : > { %v923_v29 = vpop.xlane.xlu1 %922 }
 0x35c   : > { %v1902_v48 = vpop.eup %1901  ;;  %1911 = vpow2.f32 %v974_v22  ;;  %v976_v37 = vmul.f32 1.442695, %v954_v49  ;;  %v955_v47 = vsub.f32 %v2291_v17, %v923_v29 }
 0x35d   : > { %v996_v52 = vsel %vm899_vm1, %v1902_v48, 0.0  ;;  %v1904_v21 = vpop.eup %1903 }
 0x35e   : > { %1913 = vpow2.f32 %v976_v37  ;;  %v978_v3 = vmul.f32 1.442695, %v955_v47  ;;  %997 = vadd.xlane.f32.xlu0 %v996_v52  ;;  %v1002_v5 = vsel %vm899_vm1, %v1904_v21, 0.0 }
 0x35f   : > { %v1906_v10 = vpop.eup %1905 }
 0x360   : > { %v1908_v31 = vpop.eup %1907  ;;  %v1045_v45 = vpack.c.bf16 %v1906_v10, %v1904_v21  ;;  %1915 = vpow2.f32 %v978_v3  ;;  %v1005_v14 = vsel %vm899_vm1, %v1906_v10, 0.0 }
 0x361   : > { %v999_v57 = vsel %vm899_vm1, %v1908_v31, 0.0  ;;  %v1044_v9 = vpack.c.bf16 %v1908_v31, %v1902_v48 }
 0x362   : > { %1003 = vadd.xlane.f32.xlu0 %v1002_v5  ;;  %1000 = vadd.xlane.f32.xlu1 %v999_v57 }
 0x363   : > { %1816 = vmatprep.mubr.msk.bf16.mxu0 %vm899_vm1, %v1044_v9 }
 0x364   : > { %v1910_v17 = vpop.eup %1909  ;;  %1817 = vmatmul.mubr.msk.bf16.vlgmr.msra.gmra.mrb[32].mxu0 %vm899_vm1, %v1045_v45 }
 0x365   : > { %v1008_v62 = vsel %vm899_vm1, %v1910_v17, 0.0 }
 0x366   : > { %v1912_v33 = vpop.eup %1911  ;;  %1009 = vadd.xlane.f32.xlu0 %v1008_v62  ;;  %1006 = vadd.xlane.f32.xlu1 %v1005_v14 }
 0x367   : > { %v1046_v53 = vpack.c.bf16 %v1912_v33, %v1910_v17  ;;  %v1011_v27 = vsel %vm899_vm1, %v1912_v33, 0.0 }
 0x368   : > { %v1914_v16 = vpop.eup %1913 }
 0x369   : > { %1820 = vmatprep.mubr.msk.bf16.mxu0 %vm899_vm1, %v1046_v53  ;;  %v1014_v25 = vsel %vm899_vm1, %v1914_v16, 0.0 }
 0x36a   : > { %v1916_v8 = vpop.eup %1915  ;;  %1015 = vadd.xlane.f32.xlu0 %v1014_v25  ;;  %1012 = vadd.xlane.f32.xlu1 %v1011_v27 }
 0x36b   : > { %v1047_v19 = vpack.c.bf16 %v1916_v8, %v1914_v16  ;;  %v1017_v49 = vsel %vm899_vm1, %v1916_v8, 0.0 }
 0x36d   : > { %v926_v22 = vpop.xlane.xlu0 %925  ;;  %1821 = vmatmul.mubr.msk.bf16.gmra.mrb[36].mxu0 %vm899_vm1, %v1047_v19 }
 0x36e   : > { %v956_v29 = vsub.f32 %v2301_v55, %v926_v22  ;;  %1018 = vadd.xlane.f32.xlu1 %v1017_v49 }
 0x36f   : > { %v929_v48 = vpop.xlane.xlu1 %928 }
 0x370   : > { %v980_v37 = vmul.f32 1.442695, %v956_v29  ;;  %v957_v47 = vsub.f32 %v2307_v60, %v929_v48 }
 0x371   : > { %v932_v52 = vpop.xlane.xlu0 %931 }
 0x372   : > { %1917 = vpow2.f32 %v980_v37  ;;  %v982_v21 = vmul.f32 1.442695, %v957_v47  ;;  %v958_v3 = vsub.f32 %v2299_v13, %v932_v52 }
 0x373   : > { %v935_v10 = vpop.xlane.xlu1 %934 }
 0x374   : > { %1919 = vpow2.f32 %v982_v21  ;;  %v984_v31 = vmul.f32 1.442695, %v958_v3  ;;  %v959_v45 = vsub.f32 %v2303_v12, %v935_v10 }
 0x375   : > { %v938_v5 = vpop.xlane.xlu0 %937 }
 0x376   : > { %1921 = vpow2.f32 %v984_v31  ;;  %v986_v57 = vmul.f32 1.442695, %v959_v45  ;;  %v960_v55 = vsub.f32 %v2317_v51, %v938_v5  ;;  %v1891_v5 = vld [vmem:[%s2545_s3] sm:$0xff]  }
 0x377   : > { %v941_v9 = vpop.xlane.xlu1 %940  ;;  %1840 = vmatprep.subr.bf16.mxu0 %v1891_v5 }
 0x378   : > { %1923 = vpow2.f32 %v986_v57  ;;  %v988_v17 = vmul.f32 1.442695, %v960_v55  ;;  %v961_v60 = vsub.f32 %v2323_v15, %v941_v9  ;;  %1841 = vmatpush3.bf16.msra.mxu0 %v1891_v5  ;;  %v1892_v57 = vld [vmem:[%s2545_s3 + $0x8] sm:$0xff]  }
 0x379   : > { %v944_v62 = vpop.xlane.xlu0 %943  ;;  %1842 = vmatprep.subr.bf16.mxu0 %v1892_v57 }
 0x37a   : > { %1925 = vpow2.f32 %v988_v17  ;;  %v990_v14 = vmul.f32 1.442695, %v961_v60  ;;  %v962_v13 = vsub.f32 %v2313_v24, %v944_v62 }
 0x37b   : > { %v947_v33 = vpop.xlane.xlu1 %946 }
 0x37c   : > { %v1918_v53 = vpop.eup %1917  ;;  %1927 = vpow2.f32 %v990_v14  ;;  %v992_v16 = vmul.f32 1.442695, %v962_v13  ;;  %v963_v12 = vsub.f32 %v2319_v11, %v947_v33  ;;  %1843 = vmatpush3.bf16.msra.mxu0 %v1892_v57  ;;  %v1260_v13 = vsub.s32 3, %v2070_v18 }
 0x37d   : > { %v1020_v25 = vsel %vm899_vm1, %v1918_v53, 0.0  ;;  %v1240_v33 = vsub.s32 2, %v2070_v18 }
 0x37e   : > { %v1920_v27 = vpop.eup %1919  ;;  %1929 = vpow2.f32 %v992_v16  ;;  %v994_v51 = vmul.f32 1.442695, %v963_v12  ;;  %1021 = vadd.xlane.f32.xlu0 %v1020_v25  ;;  %v2374_v12 = vrot.slane %v2076_v20, %v1260_v13 }
 0x37f   : > { %v1023_v8 = vsel %vm899_vm1, %v1920_v27, 0.0  ;;  %v1048_v15 = vpack.c.bf16 %v1920_v27, %v1918_v53  ;;  %v2377_v25 = vrot.slane %v2076_v20, %v1240_v33  ;;  %v1296_v27 = vsub.s32 4, %v2070_v18 }
 0x380   : > { %v1922_v19 = vpop.eup %1921  ;;  %1931 = vpow2.f32 %v994_v51  ;;  %1024 = vadd.xlane.f32.xlu1 %v1023_v8  ;;  %v1265_v23 = vmul.f32 %v2374_v12, %v438_v39  ;;  %v1268_v33 = vmul.f32 %v2374_v12, %v441_v58  ;;  %v1276_v41 = vmul.f32 %v2374_v12, %v449_v1 }
 0x381   : > { %1832 = vmatprep.mubr.msk.bf16.mxu1 %vm899_vm1, %v1048_v15  ;;  %v1026_v24 = vsel %vm899_vm1, %v1922_v19, 0.0 }
 0x382   : > { %v1924_v22 = vpop.eup %1923  ;;  %1027 = vadd.xlane.f32.xlu0 %v1026_v24 }
 0x383   : > { %v1049_v49 = vpack.c.bf16 %v1924_v22, %v1922_v19  ;;  %v1029_v11 = vsel %vm899_vm1, %v1924_v22, 0.0 }
 0x384   : > { %v1926_v29 = vpop.eup %1925  ;;  %1030 = vadd.xlane.f32.xlu1 %v1029_v11 }
 0x385   : > { %1833 = vmatmul.mubr.msk.bf16.vlgmr.msra.gmra.mrb[48].mxu1 %vm899_vm1, %v1049_v49  ;;  %v1032_v48 = vsel %vm899_vm1, %v1926_v29, 0.0 }
 0x386   : > { %v1928_v37 = vpop.eup %1927  ;;  %1033 = vadd.xlane.f32.xlu0 %v1032_v48  ;;  %v1264_v48 = vmul.f32 %v2374_v12, %v437_v38 }
 0x387   : > { %v1035_v47 = vsel %vm899_vm1, %v1928_v37, 0.0  ;;  %v1050_v52 = vpack.c.bf16 %v1928_v37, %v1926_v29 }
 0x388   : > { %v1930_v21 = vpop.eup %1929  ;;  %1036 = vadd.xlane.f32.xlu1 %v1035_v47  ;;  %v2385_v47 = vrot.slane %v2076_v20, %v1296_v27  ;;  %v1263_v20 = vmul.f32 %v2374_v12, %v436_v43 }
 0x389   : > { %1836 = vmatprep.mubr.msk.bf16.mxu1 %vm899_vm1, %v1050_v52  ;;  %v1038_v3 = vsel %vm899_vm1, %v1930_v21, 0.0 }
 0x38a   : > { %v1932_v10 = vpop.eup %1931  ;;  %1039 = vadd.xlane.f32.xlu0 %v1038_v3  ;;  %v1262_v3 = vmul.f32 %v2374_v12, %v435_v42 }
 0x38b   : > { %v1041_v31 = vsel %vm899_vm1, %v1932_v10, 0.0  ;;  %v1051_v45 = vpack.c.bf16 %v1932_v10, %v1930_v21 }
 0x38c   : > { %1042 = vadd.xlane.f32.xlu1 %v1041_v31 }
 0x38d   : > { %1837 = vmatmul.mubr.msk.bf16.gmra.mrb[52].mxu1 %vm899_vm1, %v1051_v45 }
 0x3eb   : > { %v998_v55 = vpop.xlane.xlu0 %997 }
 0x3ef   : > { %v1001_v9 = vpop.xlane.xlu1 %1000  ;;  %v1004_v17 = vpop.xlane.xlu0 %1003 }
 0x3f0   : > { %1933 = vrcp.f32 %v1004_v17 }
 0x3f1   : > { %1935 = vrcp.f32 %v998_v55 }
 0x3f3   : > { %v1007_v60 = vpop.xlane.xlu1 %1006  ;;  %v1010_v62 = vpop.xlane.xlu0 %1009 }
 0x3f4   : > { %1937 = vrcp.f32 %v1007_v60 }
 0x3f5   : > { %1939 = vrcp.f32 %v1001_v9 }
 0x3f7   : > { %v1013_v14 = vpop.xlane.xlu1 %1012  ;;  %v1016_v53 = vpop.xlane.xlu0 %1015 }
 0x3f8   : > { %1941 = vrcp.f32 %v1016_v53 }
 0x3f9   : > { %1943 = vrcp.f32 %v1010_v62 }
 0x3fa   : > { %v1934_v51 = vpop.eup %1933 }
 0x3fb   : > { %v1019_v16 = vpop.xlane.xlu1 %1018  ;;  %v1936_v15 = vpop.eup %1935 }
 0x3fc   : > { %1945 = vrcp.f32 %v1019_v16 }
 0x3fd   : > { %1947 = vrcp.f32 %v1013_v14 }
 0x3fe   : > { %v1938_v22 = vpop.eup %1937 }
 0x3ff   : > { %v1940_v29 = vpop.eup %1939 }
 0x402   : > { %v1942_v17 = vpop.eup %1941 }
 0x403   : > { %v1944_v60 = vpop.eup %1943 }
 0x406   : > { %v1946_v43 = vpop.eup %1945 }
 0x40b   : > { %v1022_v62 = vpop.xlane.xlu0 %1021 }
 0x437   : > { %v1818_v8 = vpop.f32.mrb[32].mxu0 }
 0x438   : > { %v1224_v19 = vmul.f32 %v1934_v51, %v1818_v8  ;;  %v1098_v24 = vpop.f32.mrb[33].mxu0  ;;  %v1948_v8 = vpop.eup %1947 }
 0x439   : > { %v1222_v49 = vmul.f32 %v1936_v15, %v1098_v24  ;;  %v1819_v11 = vpop.f32.mrb[34].mxu0  ;;  %v1025_v15 = vpop.xlane.xlu1 %1024 }
 0x43a   : > { %v1244_v37 = vmul.f32 %v2377_v25, %v1224_v19  ;;  %v1225_v52 = vmul.f32 %v1938_v22, %v1819_v11  ;;  %v1101_v21 = vpop.f32.mrb[35].mxu0 }
 0x43b   : > { %v1242_v10 = vmul.f32 %v2377_v25, %v1222_v49  ;;  %v1223_v31 = vmul.f32 %v1940_v29, %v1101_v21  ;;  %v1266_v29 = vmul.f32 %v2374_v12, %v439_v63  ;;  %v1028_v63 = vpop.xlane.xlu0 %1027 }
 0x43c   : > { %v1280_v45 = vadd.f32 %v1264_v48, %v1244_v37  ;;  %v1245_v38 = vmul.f32 %v2377_v25, %v1225_v52  ;;  %v1269_v37 = vmul.f32 %v2374_v12, %v442_v4  ;;  %1949 = vrcp.f32 %v1028_v63 }
 0x43d   : > { %v1278_v5 = vadd.f32 %v1262_v3, %v1242_v10  ;;  %v1243_v57 = vmul.f32 %v2377_v25, %v1223_v31  ;;  %v1267_v10 = vmul.f32 %v2374_v12, %v440_v7  ;;  %1951 = vrcp.f32 %v1022_v62 }
 0x43e   : > { %v1300_v26 = vadd.f32 %v2385_v47, %v1280_v45  ;;  %v1281_v42 = vadd.f32 %v1265_v23, %v1245_v38  ;;  %v1031_v38 = vpop.xlane.xlu1 %1030 }
 0x43f   : > { %v1298_v55 = vadd.f32 %v2385_v47, %v1278_v5  ;;  %v1279_v9 = vadd.f32 %v1263_v20, %v1243_v57  ;;  %1953 = vrcp.f32 %v1031_v38 }
 0x440   : > { %v1301_v30 = vadd.f32 %v2385_v47, %v1281_v42  ;;  %v1822_v39 = vpop.f32.mrb[36].mxu0  ;;  %v1316_v53 = vmax.f32 %v1300_v26, 0.0  ;;  %v1034_v42 = vpop.xlane.xlu0 %1033  ;;  %1955 = vrcp.f32 %v1025_v15 }
 0x441   : > { %v1299_v14 = vadd.f32 %v2385_v47, %v1279_v9  ;;  %v1228_v34 = vmul.f32 %v1942_v17, %v1822_v39  ;;  %v1114_v13 = vpop.f32.mrb[37].mxu0  ;;  %v1314_v19 = vmax.f32 %v1298_v55, 0.0 }
 0x442   : > { %v1317_v16 = vmax.f32 %v1301_v30, 0.0  ;;  %v1226_v27 = vmul.f32 %v1944_v60, %v1114_v13  ;;  %v1823_v51 = vpop.f32.mrb[38].mxu0  ;;  %v1037_v17 = vpop.xlane.xlu1 %1036 }
 0x443   : > { %v1315_v24 = vmax.f32 %v1299_v14, 0.0  ;;  %v1248_v22 = vmul.f32 %v2377_v25, %v1228_v34  ;;  %v1229_v49 = vmul.f32 %v1946_v43, %v1823_v51  ;;  %v1117_v11 = vpop.f32.mrb[39].mxu0 }
 0x444   : > { %v1331_v48 = vpack.c.bf16 %v1317_v16, %v1316_v53  ;;  %v1246_v50 = vmul.f32 %v2377_v25, %v1226_v27  ;;  %v1227_v58 = vmul.f32 %v1948_v8, %v1117_v11  ;;  %v1040_v30 = vpop.xlane.xlu0 %1039  ;;  %v1272_v27 = vmul.f32 %v2374_v12, %v445_v35 }
 0x445   : > { %v1284_v52 = vadd.f32 %v1268_v33, %v1248_v22  ;;  %v1249_v21 = vmul.f32 %v2377_v25, %v1229_v49  ;;  %v1330_v3 = vpack.c.bf16 %v1315_v24, %v1314_v19  ;;  %1957 = vrcp.f32 %v1040_v30 }
 0x446   : > { %v1282_v31 = vadd.f32 %v1266_v29, %v1246_v50  ;;  %v1247_v54 = vmul.f32 %v2377_v25, %v1227_v58  ;;  %v1043_v39 = vpop.xlane.xlu1 %1042  ;;  %1959 = vrcp.f32 %v1034_v42  ;;  %v1950_v60 = vpop.eup %1949  ;;  %v1270_v19 = vmul.f32 %v2374_v12, %v443_v40 }
 0x447   : > { %v1304_v23 = vadd.f32 %v2385_v47, %v1284_v52  ;;  %v1285_v45 = vadd.f32 %v1269_v37, %v1249_v21  ;;  %1844 = vmatprep.mubr.msk.bf16.mxu0 %vm313_vm0, %v1330_v3  ;;  %1961 = vrcp.f32 %v1043_v39  ;;  %v1952_v34 = vpop.eup %1951  ;;  %v1273_v49 = vmul.f32 %v2374_v12, %v446_v44 }
 0x448   : > { %v1302_v59 = vadd.f32 %v2385_v47, %v1282_v31  ;;  %v1283_v4 = vadd.f32 %v1267_v10, %v1247_v54  ;;  %1845 = vmatmul.mubr.msk.bf16.vlgmr.msra.gmra.mrb[40].mxu0 %vm313_vm0, %v1331_v48  ;;  %1963 = vrcp.f32 %v1037_v17  ;;  %v1271_v35 = vmul.f32 %v2374_v12, %v444_v46 }
 0x449   : > { %v1305_v20 = vadd.f32 %v2385_v47, %v1285_v45  ;;  %v1320_v7 = vmax.f32 %v1304_v23, 0.0  ;;  %v1954_v33 = vpop.eup %1953  ;;  %v2551_v46 = vmax.f32 %v2132_v61, 0.0  ;;  %v2552_v61 = vmax.f32 %v2138_v2, 0.0 }
 0x44a   : > { %v1303_v0 = vadd.f32 %v2385_v47, %v1283_v4  ;;  %v1318_v57 = vmax.f32 %v1302_v59, 0.0  ;;  %v1956_v16 = vpop.eup %1955 }
 0x44b   : > { %v1321_v5 = vmax.f32 %v1305_v20, 0.0  ;;  %v1274_v31 = vmul.f32 %v2374_v12, %v2551_v46 }
 0x44c   : > { %v1319_v26 = vmax.f32 %v1303_v0, 0.0 }
 0x44d   : > { %v1333_v55 = vpack.c.bf16 %v1321_v5, %v1320_v7 }
 0x44e   : > { %v1332_v9 = vpack.c.bf16 %v1319_v26, %v1318_v57  ;;  %v1277_v57 = vmul.f32 %v2374_v12, %v2552_v61 }
 0x44f   : > { %v1958_v50 = vpop.eup %1957 }
 0x450   : > { %1848 = vmatprep.mubr.msk.bf16.mxu0 %vm313_vm0, %v1332_v9  ;;  %v1960_v52 = vpop.eup %1959  ;;  %v2553_v9 = vmax.f32 %v2142_v6, 0.0 }
 0x451   : > { %1849 = vmatmul.mubr.msk.bf16.gmra.mrb[44].mxu0 %vm313_vm0, %v1333_v55  ;;  %v1962_v10 = vpop.eup %1961 }
 0x452   : > { %v1964_v45 = vpop.eup %1963  ;;  %v1275_v17 = vmul.f32 %v2374_v12, %v2553_v9  ;;  %v1970_v9 = vld [vmem:[%s2033_s28 + $0x28] sm:$0xff]  }
 0x458   : > { %v1834_v14 = vpop.f32.mrb[48].mxu1 }
 0x459   : > { %v1232_v13 = vmul.f32 %v1950_v60, %v1834_v14  ;;  %v1175_v43 = vpop.f32.mrb[49].mxu1 }
 0x45a   : > { %v1230_v62 = vmul.f32 %v1952_v34, %v1175_v43  ;;  %v1835_v53 = vpop.f32.mrb[50].mxu1 }
 0x45b   : > { %v1252_v51 = vmul.f32 %v2377_v25, %v1232_v13  ;;  %v1233_v8 = vmul.f32 %v1954_v33, %v1835_v53  ;;  %v1178_v15 = vpop.f32.mrb[51].mxu1 }
 0x45c   : > { %v1250_v24 = vmul.f32 %v2377_v25, %v1230_v62  ;;  %v1231_v22 = vmul.f32 %v1956_v16, %v1178_v15 }
 0x45d   : > { %v1288_v11 = vadd.f32 %v1272_v27, %v1252_v51  ;;  %v1253_v28 = vmul.f32 %v2377_v25, %v1233_v8  ;;  %v1344_v27 = vsub.s32 5, %v2070_v18  ;;  %v1965_v51 = vld [vmem:[%s2546_s4] sm:$0xff] }
 0x45e   : > { %v1286_v29 = vadd.f32 %v1270_v19, %v1250_v24  ;;  %v1251_v48 = vmul.f32 %v2377_v25, %v1231_v22  ;;  %v1967_v19 = vld [vmem:[%s2033_s28] sm:$0xff]  }
 0x45f   : > { %v1308_v32 = vadd.f32 %v2385_v47, %v1288_v11  ;;  %v1289_v40 = vadd.f32 %v1273_v49, %v1253_v28  ;;  %v2475_v8 = vrot.slane %v1965_v51, %v1344_v27  ;;  %v1479_v24 = vunpack.c.l.bf16 %v1967_v19 }
 0x460   : > { %v1306_v58 = vadd.f32 %v2385_v47, %v1286_v29  ;;  %v1287_v37 = vadd.f32 %v1271_v35, %v1251_v48  ;;  %v1838_v36 = vpop.f32.mrb[52].mxu1  ;;  %v1480_v35 = vunpack.c.h.bf16 %v1967_v19  ;;  %v1972_v19 = vld [vmem:[%s2033_s28 + $0x38] sm:$0xff]  }
 0x461   : > { %v1309_v44 = vadd.f32 %v2385_v47, %v1289_v40  ;;  %v1236_v21 = vmul.f32 %v1958_v50, %v1838_v36  ;;  %v1191_v3 = vpop.f32.mrb[53].mxu1  ;;  %v1324_v59 = vmax.f32 %v1308_v32, 0.0 }
 0x462   : > { %v1307_v54 = vadd.f32 %v2385_v47, %v1287_v37  ;;  %v1234_v63 = vmul.f32 %v1960_v52, %v1191_v3  ;;  %v1839_v23 = vpop.f32.mrb[54].mxu1  ;;  %v1322_v7 = vmax.f32 %v1306_v58, 0.0 }
 0x463   : > { %v1325_v4 = vmax.f32 %v1309_v44, 0.0  ;;  %v1256_v38 = vmul.f32 %v2377_v25, %v1236_v21  ;;  %v1237_v20 = vmul.f32 %v1962_v10, %v1839_v23  ;;  %v1194_v0 = vpop.f32.mrb[55].mxu1  ;;  %v1968_v10 = vld [vmem:[%s2033_s28 + $0x18] sm:$0xff]  }
 0x464   : > { %v1323_v5 = vmax.f32 %v1307_v54, 0.0  ;;  %v1254_v56 = vmul.f32 %v2377_v25, %v1234_v63  ;;  %v1235_v1 = vmul.f32 %v1964_v45, %v1194_v0  ;;  %v1486_v45 = vunpack.c.h.bf16 %v1968_v10 }
 0x465   : > { %v1292_v26 = vadd.f32 %v1276_v41, %v1256_v38  ;;  %v1257_v42 = vmul.f32 %v2377_v25, %v1237_v20  ;;  %v1335_v55 = vpack.c.bf16 %v1325_v4, %v1324_v59  ;;  %v1485_v41 = vunpack.c.l.bf16 %v1968_v10 }
 0x466   : > { %v1290_v30 = vadd.f32 %v1274_v31, %v1254_v56  ;;  %v1255_v39 = vmul.f32 %v2377_v25, %v1235_v1  ;;  %v1334_v60 = vpack.c.bf16 %v1323_v5, %v1322_v7  ;;  %v1969_v31 = vld [vmem:[%s2033_s28 + $0x10] sm:$0xff]  }
 0x467   : > { %v1312_v14 = vadd.f32 %v2385_v47, %v1292_v26  ;;  %v1293_v34 = vadd.f32 %v1277_v57, %v1257_v42  ;;  %v1483_v54 = vunpack.c.l.bf16 %v1969_v31  ;;  %v1484_v38 = vunpack.c.h.bf16 %v1969_v31 }
 0x468   : > { %v1310_v13 = vadd.f32 %v2385_v47, %v1290_v30  ;;  %v1291_v2 = vadd.f32 %v1275_v17, %v1255_v39  ;;  %1852 = vmatprep.mubr.msk.bf16.mxu0 %vm313_vm0, %v1334_v60  ;;  %v1489_v17 = vunpack.c.l.bf16 %v1970_v9  ;;  %v1971_v30 = vld [vmem:[%s2033_s28 + $0x20] sm:$0xff]  }
 0x469   : > { %v1313_v43 = vadd.f32 %v2385_v47, %v1293_v34  ;;  %1853 = vmatmul.mubr.msk.bf16.gmra.mrb[48].mxu0 %vm313_vm0, %v1335_v55  ;;  %v1328_v12 = vmax.f32 %v1312_v14, 0.0  ;;  %v1487_v39 = vunpack.c.l.bf16 %v1971_v30 }
 0x46a   : > { %v1311_v6 = vadd.f32 %v2385_v47, %v1291_v2  ;;  %v1326_v33 = vmax.f32 %v1310_v13, 0.0  ;;  %v1966_v47 = vld [vmem:[%s2033_s28 + $0x8] sm:$0xff]   ;;  %v1490_v13 = vunpack.c.h.bf16 %v1970_v9  ;;  %v1488_v2 = vunpack.c.h.bf16 %v1971_v30 }
 0x46b   : > { %v1329_v25 = vmax.f32 %v1313_v43, 0.0  ;;  %v1481_v15 = vunpack.c.l.bf16 %v1966_v47  ;;  %v1482_v28 = vunpack.c.h.bf16 %v1966_v47 }
 0x46c   : > { %v1327_v62 = vmax.f32 %v1311_v6, 0.0 }
 0x46d   : > { %v1337_v53 = vpack.c.bf16 %v1329_v25, %v1328_v12 }
 0x46e   : > { %v1336_v16 = vpack.c.bf16 %v1327_v62, %v1326_v33 }
 0x470   : > { %1856 = vmatprep.mubr.msk.bf16.mxu0 %vm313_vm0, %v1336_v16 }
 0x471   : > { %1857 = vmatmul.mubr.msk.bf16.gmra.mrb[52].mxu0 %vm313_vm0, %v1337_v53 }
 0x51b   : > { %v1846_v22 = vpop.f32.mrb[40].mxu0 }
 0x51c   : > { %v1425_v49 = vadd.f32 %v1846_v22, %v2475_v8  ;;  %v1416_v11 = vpop.f32.mrb[41].mxu0 }
 0x51d   : > { %v1417_v29 = vadd.f32 %v1416_v11, %v2475_v8  ;;  %v1847_v18 = vpop.f32.mrb[42].mxu0  ;;  %v1973_v11 = vld [vmem:[%s2033_s28 + $0x30] sm:$0xff]  }
 0x51e   : > { %v1497_v48 = vadd.f32 %v1481_v15, %v1425_v49  ;;  %v1428_v32 = vadd.f32 %v1847_v18, %v2475_v8  ;;  %v1419_v40 = vpop.f32.mrb[43].mxu0  ;;  %v1494_v18 = vunpack.c.h.bf16 %v1972_v19 }
 0x51f   : > { %v1495_v50 = vadd.f32 %v1479_v24, %v1417_v29  ;;  %v1420_v58 = vadd.f32 %v1419_v40, %v2475_v8  ;;  %v1493_v24 = vunpack.c.l.bf16 %v1972_v19  ;;  %v1492_v40 = vunpack.c.h.bf16 %v1973_v11 }
 0x520   : > { %v1513_v37 = vmax.f32 %v1497_v48, 0.0  ;;  %v1498_v36 = vadd.f32 %v1482_v28, %v1428_v32  ;;  %v1491_v28 = vunpack.c.l.bf16 %v1973_v11 }
 0x521   : > { %v1511_v52 = vmax.f32 %v1495_v50, 0.0  ;;  %v1496_v44 = vadd.f32 %v1480_v35, %v1420_v58 }
 0x522   : > { %1529 = vst.msk [vmem:[%s2486_s9 + $0x10] sm:$0xff] %vm313_vm0, %v1513_v37  ;;  %v1514_v21 = vmax.f32 %v1498_v36, 0.0 }
 0x523   : > { %1527 = vst.msk [vmem:[%s2486_s9] sm:$0xff] %vm313_vm0, %v1511_v52  ;;  %v1512_v3 = vmax.f32 %v1496_v44, 0.0 }
 0x524   : > { %1530 = vst.msk [vmem:[%s2486_s9 + $0x18] sm:$0xff] %vm313_vm0, %v1514_v21  ;;  %v1850_v46 = vpop.f32.mrb[44].mxu0 }
 0x525   : > { %1528 = vst.msk [vmem:[%s2486_s9 + $0x8] sm:$0xff] %vm313_vm0, %v1512_v3  ;;  %v1441_v63 = vadd.f32 %v1850_v46, %v2475_v8  ;;  %v1432_v23 = vpop.f32.mrb[45].mxu0 }
 0x526   : > { %v1433_v59 = vadd.f32 %v1432_v23, %v2475_v8  ;;  %v1851_v4 = vpop.f32.mrb[46].mxu0 }
 0x527   : > { %v1501_v20 = vadd.f32 %v1485_v41, %v1441_v63  ;;  %v1444_v0 = vadd.f32 %v1851_v4, %v2475_v8  ;;  %v1435_v7 = vpop.f32.mrb[47].mxu0 }
 0x528   : > { %v1499_v5 = vadd.f32 %v1483_v54, %v1433_v59  ;;  %v1436_v56 = vadd.f32 %v1435_v7, %v2475_v8 }
 0x529   : > { %v1517_v1 = vmax.f32 %v1501_v20, 0.0  ;;  %v1502_v61 = vadd.f32 %v1486_v45, %v1444_v0 }
 0x52a   : > { %v1515_v57 = vmax.f32 %v1499_v5, 0.0  ;;  %v1500_v26 = vadd.f32 %v1484_v38, %v1436_v56 }
 0x52b   : > { %1533 = vst.msk [vmem:[%s2486_s9 + $0x30] sm:$0xff] %vm313_vm0, %v1517_v1  ;;  %v1518_v42 = vmax.f32 %v1502_v61, 0.0 }
 0x52c   : > { %1531 = vst.msk [vmem:[%s2486_s9 + $0x20] sm:$0xff] %vm313_vm0, %v1515_v57  ;;  %v1516_v55 = vmax.f32 %v1500_v26, 0.0 }
 0x52d   : > { %1534 = vst.msk [vmem:[%s2486_s9 + $0x38] sm:$0xff] %vm313_vm0, %v1518_v42 }
 0x52e   : > { %1532 = vst.msk [vmem:[%s2486_s9 + $0x28] sm:$0xff] %vm313_vm0, %v1516_v55 }
 0x53c   : > { %v1854_v60 = vpop.f32.mrb[48].mxu0 }
 0x53d   : > { %v1457_v14 = vadd.f32 %v1854_v60, %v2475_v8  ;;  %v1448_v34 = vpop.f32.mrb[49].mxu0 }
 0x53e   : > { %v1449_v43 = vadd.f32 %v1448_v34, %v2475_v8  ;;  %v1855_v6 = vpop.f32.mrb[50].mxu0 }
 0x53f   : > { %v1505_v12 = vadd.f32 %v1489_v17, %v1457_v14  ;;  %v1460_v25 = vadd.f32 %v1855_v6, %v2475_v8  ;;  %v1451_v33 = vpop.f32.mrb[51].mxu0 }
 0x540   : > { %v1503_v62 = vadd.f32 %v1487_v39, %v1449_v43  ;;  %v1452_v53 = vadd.f32 %v1451_v33, %v2475_v8 }
 0x541   : > { %v1521_v16 = vmax.f32 %v1505_v12, 0.0  ;;  %v1506_v27 = vadd.f32 %v1490_v13, %v1460_v25 }
 0x542   : > { %v1519_v51 = vmax.f32 %v1503_v62, 0.0  ;;  %v1504_v47 = vadd.f32 %v1488_v2, %v1452_v53 }
 0x543   : > { %1537 = vst.msk [vmem:[%s2486_s9 + $0x50] sm:$0xff] %vm313_vm0, %v1521_v16  ;;  %v1522_v15 = vmax.f32 %v1506_v27, 0.0 }
 0x544   : > { %1535 = vst.msk [vmem:[%s2486_s9 + $0x40] sm:$0xff] %vm313_vm0, %v1519_v51  ;;  %v1520_v22 = vmax.f32 %v1504_v47, 0.0  ;;  %v1858_v49 = vpop.f32.mrb[52].mxu0 }
 0x545   : > { %1538 = vst.msk [vmem:[%s2486_s9 + $0x58] sm:$0xff] %vm313_vm0, %v1522_v15  ;;  %v1473_v35 = vadd.f32 %v1858_v49, %v2475_v8  ;;  %v1464_v29 = vpop.f32.mrb[53].mxu0 }
 0x546   : > { %1536 = vst.msk [vmem:[%s2486_s9 + $0x48] sm:$0xff] %vm313_vm0, %v1520_v22  ;;  %v1465_v48 = vadd.f32 %v1464_v29, %v2475_v8  ;;  %v1859_v32 = vpop.f32.mrb[54].mxu0 }
 0x547   : > { %v1509_v50 = vadd.f32 %v1493_v24, %v1473_v35  ;;  %v1476_v58 = vadd.f32 %v1859_v32, %v2475_v8  ;;  %v1467_v37 = vpop.f32.mrb[55].mxu0 }
 0x548   : > { %v1507_v36 = vadd.f32 %v1491_v28, %v1465_v48  ;;  %v1468_v52 = vadd.f32 %v1467_v37, %v2475_v8 }
 0x549   : > { %v1525_v44 = vmax.f32 %v1509_v50, 0.0  ;;  %v1510_v21 = vadd.f32 %v1494_v18, %v1476_v58 }
 0x54a   : > { %v1523_v3 = vmax.f32 %v1507_v36, 0.0  ;;  %v1508_v10 = vadd.f32 %v1492_v40, %v1468_v52 }
 0x54b   : > { %1541 = vst.msk [vmem:[%s2486_s9 + $0x70] sm:$0xff] %vm313_vm0, %v1525_v44  ;;  %v1526_v41 = vmax.f32 %v1510_v21, 0.0 }
 0x54c   : > { %1539 = vst.msk [vmem:[%s2486_s9 + $0x60] sm:$0xff] %vm313_vm0, %v1523_v3  ;;  %v1524_v46 = vmax.f32 %v1508_v10, 0.0 }
 0x54d   : > { %1542 = vst.msk [vmem:[%s2486_s9 + $0x78] sm:$0xff] %vm313_vm0, %v1526_v41 }
 0x54e   : > { %1540 = vst.msk [vmem:[%s2486_s9 + $0x68] sm:$0xff] %vm313_vm0, %v1524_v46 }
 0x54f PF: > { %s15_s18 = sadd.s32 1, %s1980_s18  }
 0x550   : > { %p12_p4 = scmp.ge.s32.totalorder %s15_s18, 4  }
 0x552   :  { %14 = sbr.rel (!%p12_p4) target bundleno = 1 (0x1), region = 70 }

</bundles_post_ra>
